<compile_context>
chip_gen: v5e
topology: v5e:2x2
jax: 0.10.0
libtpu: 0.0.40
codegen_flags: <defaults>
</compile_context>

<pallas_src>
import math
from functools import partial

import numpy as np
import jax
import jax.numpy as jnp
from jax.experimental import pallas as pl
from jax.experimental.pallas import tpu as pltpu


# ----------------------------- kernel helpers -----------------------------

def _layernorm(x, g, b, eps=1e-5):
    mu = jnp.mean(x, axis=-1, keepdims=True)
    var = jnp.mean((x - mu) ** 2, axis=-1, keepdims=True)
    return (x - mu) * jax.lax.rsqrt(var + eps) * g + b


def _bf16(x):
    return x.astype(jnp.bfloat16)


# --------------------------- fused Pallas kernel ---------------------------

def fused_dark_kernel(emb_ref, pe_ref,
                      wq_ref, wk_ref, wv_ref, wo_ref, w1_ref, w2_ref, vec_ref,
                      gf_ref, bf_ref, hw1_ref, hb1_ref, hw2_ref, hb2_ref,
                      o_ref,
                      x_vmem, attn_vmem,
                      *, n_heads, q_d, v_d):
    """grid = (B//Bt, n_l): batch-block axis "parallel", layer axis "arbitrary".

    A block of Bt sequences stays resident in VMEM for the whole layer stack while
    the stacked per-layer weights are pipelined behind compute by the BlockSpec
    machinery.  bf16 MXU matmuls with M = Bt*S rows; f32 everywhere else.
    """
    l = pl.program_id(1)
    n_l = pl.num_programs(1)

    Bt, S, D = x_vmem.shape
    Hq = wq_ref.shape[-1]
    Hv = wv_ref.shape[-1]
    dff = w1_ref.shape[-1]

    # -------- l == 0: PositionalEncoding module (concat[x, pe]; dropout p=0) --------
    @pl.when(l == 0)
    def _init():
        pe_b = jnp.broadcast_to(pe_ref[...][None, :, :], emb_ref.shape)
        x_vmem[...] = jnp.concatenate([emb_ref[...], pe_b], axis=-1)

    # per-layer packed vectors: [BQ, BK, BV, BO, B1, B2, G1, BE1, G2, BE2]
    vr = vec_ref[0]                                                    # (10, Wmax)

    def vec(i, w):
        return vr[i, :w][None, :]

    bq, bk, bv = vec(0, Hq), vec(1, Hq), vec(2, Hv)
    bo, b1, b2 = vec(3, D), vec(4, dff), vec(5, D)
    g1, be1, g2, be2 = vec(6, D), vec(7, D), vec(8, D), vec(9, D)

    x = x_vmem[...].reshape(Bt * S, D)                                 # f32 working view
    xb = _bf16(x)

    # -------- multi-head self-attention (full attention) --------
    q = jnp.dot(xb, wq_ref[0], preferred_element_type=jnp.float32) + bq
    k = jnp.dot(xb, wk_ref[0], preferred_element_type=jnp.float32) + bk
    v = jnp.dot(xb, wv_ref[0], preferred_element_type=jnp.float32) + bv
    q = q * (1.0 / math.sqrt(q_d))            # fold softmax temperature into q once

    # cast once, reshape to per-sequence layout for the batched score/PV matmuls
    qb = _bf16(q).reshape(Bt, S, Hq)
    kb = _bf16(k).reshape(Bt, S, Hq)
    vb = _bf16(v).reshape(Bt, S, Hv)

    # heads in pairs: lane-aligned 2*q_d slabs + one lane-aligned store per pair
    for h0 in range(0, n_heads, 2):
        hp = min(2, n_heads - h0)
        q_sl = qb[:, :, h0 * q_d:(h0 + hp) * q_d]
        k_sl = kb[:, :, h0 * q_d:(h0 + hp) * q_d]
        v_sl = vb[:, :, h0 * v_d:(h0 + hp) * v_d]
        outs = []
        for j in range(hp):
            qh = q_sl[:, :, j * q_d:(j + 1) * q_d]
            kh = k_sl[:, :, j * q_d:(j + 1) * q_d]
            vh = v_sl[:, :, j * v_d:(j + 1) * v_d]
            s = jnp.einsum('bqd,bkd->bqk', qh, kh,
                           preferred_element_type=jnp.float32)         # (Bt, S, S)
            s = s - jnp.max(s, axis=-1, keepdims=True)
            p = jnp.exp(s)
            p = p * pl.reciprocal(jnp.sum(p, axis=-1, keepdims=True), approx=True)
            outs.append(jnp.einsum('bqk,bkd->bqd', _bf16(p), vh,
                                   preferred_element_type=jnp.float32))
        attn_vmem[:, :, h0 * v_d:(h0 + hp) * v_d] = _bf16(
            jnp.concatenate(outs, axis=-1))

    attn = jnp.dot(attn_vmem[...].reshape(Bt * S, Hv), wo_ref[0],
                   preferred_element_type=jnp.float32) + bo

    # -------- post-LN residual blocks --------
    x = x + attn
    x = _layernorm(x, g1, be1)
    y = jnp.dot(_bf16(x), w1_ref[0], preferred_element_type=jnp.float32) + b1
    y = jnp.maximum(y, 0.0)
    y = jnp.dot(_bf16(y), w2_ref[0], preferred_element_type=jnp.float32) + b2
    x = _layernorm(x + y, g2, be2)
    x_vmem[...] = x.reshape(Bt, S, D)

    # -------- last layer: fused final LN + LM head + log_softmax (lane-dense) --------
    @pl.when(l == n_l - 1)
    def _finalize():
        Vpad = o_ref.shape[-1]
        xf = _layernorm(x, gf_ref[...], bf_ref[...])
        hdn = jnp.dot(_bf16(xf), hw1_ref[...],
                      preferred_element_type=jnp.float32) + hb1_ref[...]
        hdn = jnp.maximum(hdn, 0.0)
        # padded columns carry bias -1e9 -> exact zeros in the softmax sum
        logits = jnp.dot(_bf16(hdn), hw2_ref[...],
                         preferred_element_type=jnp.float32) + hb2_ref[...]
        m = jnp.max(logits, axis=-1, keepdims=True)
        lse = jnp.log(jnp.sum(jnp.exp(logits - m), axis=-1, keepdims=True)) + m
        o_ref[...] = (logits - lse).reshape(Bt, S, Vpad)


# ------------------------------ call wrapper -------------------------------

_BIG = ("WQ", "WK", "WV", "WO", "W1", "W2")
_VECS = ("BQ", "BK", "BV", "BO", "B1", "B2", "G1", "BE1", "G2", "BE2")


def _pick_bt(B, bt_max=8):
    """Largest divisor of B <= bt_max, preferring >= 2 parallel grid blocks."""
    divs = [d for d in range(1, min(B, bt_max) + 1) if B % d == 0]
    pref = [d for d in divs if B // d >= 2]
    return max(pref) if pref else max(divs)


def _vmem_limit_bytes():
    """min(0.7 * physical VMEM, 64 MiB); safe on v5e/v6e (128 MiB) and v7x (64 MiB)."""
    try:
        cap = pltpu.get_tpu_info().vmem_capacity_bytes
        return min(int(cap * 0.7), 64 * 1024 * 1024)
    except Exception:
        return 48 * 1024 * 1024


def dark_forward(tokens, params, pe, n_heads, q_d, v_d, *, bt_max=8):
    # Embedding gather stays in XLA (glue); everything after is one fused kernel.
    # TODO(synk): `generate` (multinomial sampling loop) is host-side control flow,
    # not kernelized; the embedding gather also stays in XLA.
    emb = params["embed"][tokens].astype(jnp.float32)                  # (B, S, ff_d//2)
    B, S, half = emb.shape
    D = 2 * half
    pe_s = pe[:S].astype(jnp.float32)                                  # (S, ff_d//2)
    n_l = params["WQ"].shape[0]
    V = params["head_w2"].shape[-1]
    Vpad = max(128, ((V + 127) // 128) * 128)                          # lane-dense logits
    Bt = _pick_bt(B, bt_max)

    # pack the 10 small per-layer f32 vectors into one (n_l, 10, Wmax) array
    widths = [params[k].shape[-1] for k in _VECS]
    Wmax = max(widths)
    vecs = jnp.stack(
        [jnp.pad(params[k][:, 0, :], ((0, 0), (0, Wmax - params[k].shape[-1])))
         for k in _VECS], axis=1)                                      # (n_l, 10, Wmax)

    # lane-dense head: pad output columns to Vpad; padded bias = -1e9 (masked lanes)
    hw2_p = jnp.pad(params["head_w2"], ((0, 0), (0, Vpad - V)))
    hb2_p = jnp.pad(params["head_b2"], ((0, 0), (0, Vpad - V)), constant_values=-1e9)

    big = [params[k] for k in _BIG]
    glob = [params["gf"], params["bf"], params["head_w1"], params["head_b1"],
            hw2_p, hb2_p]

    in_specs = (
        [pl.BlockSpec((Bt, S, half), lambda b, l: (b, 0, 0)),          # embeddings block
         pl.BlockSpec((S, half), lambda b, l: (0, 0))]                 # positional enc
        + [pl.BlockSpec((1,) + w.shape[1:], lambda b, l: (l, 0, 0))    # per-layer stack
           for w in big]
        + [pl.BlockSpec((1, len(_VECS), Wmax), lambda b, l: (l, 0, 0))]  # packed vectors
        + [pl.BlockSpec(w.shape, lambda b, l: (0, 0)) for w in glob]   # global head/LN
    )

    out_pad = pl.pallas_call(
        partial(fused_dark_kernel, n_heads=n_heads, q_d=q_d, v_d=v_d),
        out_shape=jax.ShapeDtypeStruct((B, S, Vpad), jnp.float32),
        grid=(B // Bt, n_l),
        in_specs=in_specs,
        out_specs=pl.BlockSpec((Bt, S, Vpad), lambda b, l: (b, 0, 0)),
        scratch_shapes=[pltpu.VMEM((Bt, S, D), jnp.float32),            # resident x block
                        pltpu.VMEM((Bt, S, n_heads * v_d), jnp.bfloat16)],  # head outputs
        compiler_params=pltpu.CompilerParams(
            dimension_semantics=("parallel", "arbitrary"),
            vmem_limit_bytes=_vmem_limit_bytes()),
    )(emb, pe_s, *big, vecs, *glob)
    return out_pad[:, :, :V]


# ---------------------------- parameter set-up -----------------------------

def make_positional_encoding(d_model, max_len=101):
    pe = np.zeros((max_len, d_model), dtype=np.float32)
    position = np.arange(0, max_len, dtype=np.float32)[:, None]
    div_term = np.exp(np.arange(0, d_model, 2, dtype=np.float32)
                      * (-math.log(10000.0) / d_model))
    pe[:, 0::2] = np.sin(position * div_term)
    pe[:, 1::2] = np.cos(position * div_term)
    return jnp.asarray(pe)


def init_params(key, n_l, n_h, ff_d, q_d, v_d, d_ff, vocab=22, head_hidden=128):
    D = ff_d
    Hq, Hv = n_h * q_d, n_h * v_d
    keys = iter(jax.random.split(key, 16))

    def w(shape, dtype=jnp.bfloat16, scale=0.02):
        return (scale * jax.random.normal(next(keys), shape, jnp.float32)).astype(dtype)

    return {
        "embed": w((vocab, ff_d // 2), dtype=jnp.float32),
        # per-layer weights stacked on a leading n_l axis; matmul weights in bf16
        "WQ": w((n_l, D, Hq)),   "BQ": jnp.zeros((n_l, 1, Hq), jnp.float32),
        "WK": w((n_l, D, Hq)),   "BK": jnp.zeros((n_l, 1, Hq), jnp.float32),
        "WV": w((n_l, D, Hv)),   "BV": jnp.zeros((n_l, 1, Hv), jnp.float32),
        "WO": w((n_l, Hv, D)),   "BO": jnp.zeros((n_l, 1, D), jnp.float32),
        "W1": w((n_l, D, d_ff)), "B1": jnp.zeros((n_l, 1, d_ff), jnp.float32),
        "W2": w((n_l, d_ff, D)), "B2": jnp.zeros((n_l, 1, D), jnp.float32),
        "G1": jnp.ones((n_l, 1, D), jnp.float32), "BE1": jnp.zeros((n_l, 1, D), jnp.float32),
        "G2": jnp.ones((n_l, 1, D), jnp.float32), "BE2": jnp.zeros((n_l, 1, D), jnp.float32),
        # final LN + LM head
        "gf": jnp.ones((1, D), jnp.float32), "bf": jnp.zeros((1, D), jnp.float32),
        "head_w1": w((D, head_hidden)), "head_b1": jnp.zeros((1, head_hidden), jnp.float32),
        "head_w2": w((head_hidden, vocab)), "head_b2": jnp.zeros((1, vocab), jnp.float32),
    }


# ---------------------------- pure-JAX reference ----------------------------

def _ln_ref(x, g, b, eps=1e-5):
    mu = x.mean(-1, keepdims=True)
    var = ((x - mu) ** 2).mean(-1, keepdims=True)
    return (x - mu) / jnp.sqrt(var + eps) * g + b


def reference_forward(tokens, params, pe, n_heads, q_d, v_d):
    f32 = lambda a: a.astype(jnp.float32)
    x = params["embed"][tokens]
    B, S, half = x.shape
    pos = jnp.broadcast_to(pe[:S][None], (B, S, half))
    x = jnp.concatenate([x, pos], axis=-1)
    n_l = params["WQ"].shape[0]
    for li in range(n_l):
        q = (x @ f32(params["WQ"][li]) + params["BQ"][li]).reshape(B, S, n_heads, q_d)
        k = (x @ f32(params["WK"][li]) + params["BK"][li]).reshape(B, S, n_heads, q_d)
        v = (x @ f32(params["WV"][li]) + params["BV"][li]).reshape(B, S, n_heads, v_d)
        qk = jnp.einsum("nlhe,nshe->nhls", q, k) / math.sqrt(q_d)
        a = jax.nn.softmax(qk, axis=-1)
        o = jnp.einsum("nhls,nshd->nlhd", a, v).reshape(B, S, n_heads * v_d)
        x = x + (o @ f32(params["WO"][li]) + params["BO"][li])
        y = x = _ln_ref(x, params["G1"][li], params["BE1"][li])
        y = jax.nn.relu(y @ f32(params["W1"][li]) + params["B1"][li]) \
            @ f32(params["W2"][li]) + params["B2"][li]
        x = _ln_ref(x + y, params["G2"][li], params["BE2"][li])
    x = _ln_ref(x, params["gf"], params["bf"])
    logits = jax.nn.relu(x @ f32(params["head_w1"]) + params["head_b1"]) \
        @ f32(params["head_w2"]) + params["head_b2"]
    return jax.nn.log_softmax(logits, axis=2)


# ----------------------------------- main -----------------------------------

if __name__ == "__main__":
    # Small DARK config (original: n_l=12, n_h=12, ff_d=768, q_d=v_d=64, S=101).
    n_l, n_h, ff_d, q_d, v_d = 2, 2, 32, 16, 16
    d_ff = ff_d                        # feed_forward_dimensions = ff_d in DARK
    B, S = 4, 8                        # B=4 so the batch-blocked path (Bt=2) is exercised

    key = jax.random.PRNGKey(0)
    kp, kt = jax.random.split(key)
    params = init_params(kp, n_l, n_h, ff_d, q_d, v_d, d_ff)
    pe = make_positional_encoding(ff_d // 2, max_len=101)
    tokens = jax.random.randint(kt, (B, S), 0, 22, dtype=jnp.int32)

    out = jax.block_until_ready(dark_forward(tokens, params, pe, n_h, q_d, v_d))
    ref = jax.block_until_ready(reference_forward(tokens, params, pe, n_h, q_d, v_d))

    assert out.shape == (B, S, 22)
    # bf16 MXU matmuls + approx reciprocal in the kernel -> relaxed tolerance vs f32 ref.
    np.testing.assert_allclose(np.asarray(out), np.asarray(ref), rtol=2e-2, atol=2e-2)
    print("KERNEL_OK")
</pallas_src>

<mosaic_0001>
module attributes {stable_mosaic.version = 11 : i64} {
  func.func @fused_dark_kernel(%arg0: i32, %arg1: i32, %arg2: memref<2x8x16xf32, #tpu.memory_space<vmem>>, %arg3: memref<8x16xf32, #tpu.memory_space<vmem>>, %arg4: memref<1x32x32xbf16, #tpu.memory_space<vmem>>, %arg5: memref<1x32x32xbf16, #tpu.memory_space<vmem>>, %arg6: memref<1x32x32xbf16, #tpu.memory_space<vmem>>, %arg7: memref<1x32x32xbf16, #tpu.memory_space<vmem>>, %arg8: memref<1x32x32xbf16, #tpu.memory_space<vmem>>, %arg9: memref<1x32x32xbf16, #tpu.memory_space<vmem>>, %arg10: memref<1x10x32xf32, #tpu.memory_space<vmem>>, %arg11: memref<1x32xf32, #tpu.memory_space<vmem>>, %arg12: memref<1x32xf32, #tpu.memory_space<vmem>>, %arg13: memref<32x128xbf16, #tpu.memory_space<vmem>>, %arg14: memref<1x128xf32, #tpu.memory_space<vmem>>, %arg15: memref<128x128xbf16, #tpu.memory_space<vmem>>, %arg16: memref<1x128xf32, #tpu.memory_space<vmem>>, %arg17: memref<2x8x128xf32, #tpu.memory_space<vmem>>, %arg18: memref<2x8x32xf32, #tpu.memory_space<vmem>>, %arg19: memref<2x8x32xbf16, #tpu.memory_space<vmem>>) attributes {dimension_semantics = [#tpu.dimension_semantics<parallel>, #tpu.dimension_semantics<arbitrary>], iteration_bounds = array<i64: 2, 2>, scalar_prefetch = 0 : i64, scratch_operands = 2 : i64, tpu.core_type = #tpu.core_type<tc>, window_params = [{transform_indices = @transform_0, window_bounds = array<i64: 2, 8, 16>}, {pipeline_mode = #tpu.pipeline_mode<synchronous>, transform_indices = @transform_1, window_bounds = array<i64: 8, 16>}, {transform_indices = @transform_2, window_bounds = array<i64: 1, 32, 32>}, {transform_indices = @transform_3, window_bounds = array<i64: 1, 32, 32>}, {transform_indices = @transform_4, window_bounds = array<i64: 1, 32, 32>}, {transform_indices = @transform_5, window_bounds = array<i64: 1, 32, 32>}, {transform_indices = @transform_6, window_bounds = array<i64: 1, 32, 32>}, {transform_indices = @transform_7, window_bounds = array<i64: 1, 32, 32>}, {transform_indices = @transform_8, window_bounds = array<i64: 1, 10, 32>}, {pipeline_mode = #tpu.pipeline_mode<synchronous>, transform_indices = @transform_9, window_bounds = array<i64: 1, 32>}, {pipeline_mode = #tpu.pipeline_mode<synchronous>, transform_indices = @transform_10, window_bounds = array<i64: 1, 32>}, {pipeline_mode = #tpu.pipeline_mode<synchronous>, transform_indices = @transform_11, window_bounds = array<i64: 32, 128>}, {pipeline_mode = #tpu.pipeline_mode<synchronous>, transform_indices = @transform_12, window_bounds = array<i64: 1, 128>}, {pipeline_mode = #tpu.pipeline_mode<synchronous>, transform_indices = @transform_13, window_bounds = array<i64: 128, 128>}, {pipeline_mode = #tpu.pipeline_mode<synchronous>, transform_indices = @transform_14, window_bounds = array<i64: 1, 128>}, {transform_indices = @transform_15, window_bounds = array<i64: 2, 8, 128>}]} {
    %c0_i32 = arith.constant 0 : i32
    %0 = arith.cmpi eq, %arg1, %c0_i32 : i32
    %1 = arith.extui %0 : i1 to i32
    %c0_i32_0 = arith.constant 0 : i32
    %2 = arith.cmpi ne, %1, %c0_i32_0 : i32
    scf.if %2 {
      %c0_59 = arith.constant 0 : index
      %c0_60 = arith.constant 0 : index
      %168 = vector.load %arg3[%c0_59, %c0_60] : memref<8x16xf32, #tpu.memory_space<vmem>>, vector<8x16xf32>
      %169 = vector.shape_cast %168 : vector<8x16xf32> to vector<1x8x16xf32>
      %170 = vector.shape_cast %169 : vector<1x8x16xf32> to vector<1x8x16xf32>
      %171 = vector.broadcast %170 : vector<1x8x16xf32> to vector<2x8x16xf32>
      %c0_61 = arith.constant 0 : index
      %c0_62 = arith.constant 0 : index
      %c0_63 = arith.constant 0 : index
      %172 = vector.load %arg2[%c0_61, %c0_62, %c0_63] : memref<2x8x16xf32, #tpu.memory_space<vmem>>, vector<2x8x16xf32>
      %173 = tpu.concatenate %172, %171 in 2 : vector<2x8x16xf32>, vector<2x8x16xf32> -> vector<2x8x32xf32>
      %c0_64 = arith.constant 0 : index
      %c0_65 = arith.constant 0 : index
      %c0_66 = arith.constant 0 : index
      %174 = vector.load %arg18[%c0_64, %c0_65, %c0_66] : memref<2x8x32xf32, #tpu.memory_space<vmem>>, vector<2x8x32xf32>
      tpu.vector_store %arg18[%c0_64, %c0_65, %c0_66], %173 {strides = array<i32>} : memref<2x8x32xf32, #tpu.memory_space<vmem>>, vector<2x8x32xf32>,
    } else {
    }
    %c0 = arith.constant 0 : index
    %c0_1 = arith.constant 0 : index
    %c0_2 = arith.constant 0 : index
    %3 = vector.load %arg10[%c0, %c0_1, %c0_2] : memref<1x10x32xf32, #tpu.memory_space<vmem>>, vector<1x10x32xf32>
    %4 = vector.shape_cast %3 : vector<1x10x32xf32> to vector<10x32xf32>
    %5 = vector.extract_strided_slice %4 {offsets = [0, 0], sizes = [1, 32], strides = [1, 1]} : vector<10x32xf32> to vector<1x32xf32>
    %6 = vector.shape_cast %5 : vector<1x32xf32> to vector<32xf32>
    %7 = vector.shape_cast %6 : vector<32xf32> to vector<1x32xf32>
    %8 = vector.extract_strided_slice %4 {offsets = [1, 0], sizes = [1, 32], strides = [1, 1]} : vector<10x32xf32> to vector<1x32xf32>
    %9 = vector.shape_cast %8 : vector<1x32xf32> to vector<32xf32>
    %10 = vector.shape_cast %9 : vector<32xf32> to vector<1x32xf32>
    %11 = vector.extract_strided_slice %4 {offsets = [2, 0], sizes = [1, 32], strides = [1, 1]} : vector<10x32xf32> to vector<1x32xf32>
    %12 = vector.shape_cast %11 : vector<1x32xf32> to vector<32xf32>
    %13 = vector.shape_cast %12 : vector<32xf32> to vector<1x32xf32>
    %14 = vector.extract_strided_slice %4 {offsets = [3, 0], sizes = [1, 32], strides = [1, 1]} : vector<10x32xf32> to vector<1x32xf32>
    %15 = vector.shape_cast %14 : vector<1x32xf32> to vector<32xf32>
    %16 = vector.shape_cast %15 : vector<32xf32> to vector<1x32xf32>
    %17 = vector.extract_strided_slice %4 {offsets = [4, 0], sizes = [1, 32], strides = [1, 1]} : vector<10x32xf32> to vector<1x32xf32>
    %18 = vector.shape_cast %17 : vector<1x32xf32> to vector<32xf32>
    %19 = vector.shape_cast %18 : vector<32xf32> to vector<1x32xf32>
    %20 = vector.extract_strided_slice %4 {offsets = [5, 0], sizes = [1, 32], strides = [1, 1]} : vector<10x32xf32> to vector<1x32xf32>
    %21 = vector.shape_cast %20 : vector<1x32xf32> to vector<32xf32>
    %22 = vector.shape_cast %21 : vector<32xf32> to vector<1x32xf32>
    %23 = vector.extract_strided_slice %4 {offsets = [6, 0], sizes = [1, 32], strides = [1, 1]} : vector<10x32xf32> to vector<1x32xf32>
    %24 = vector.shape_cast %23 : vector<1x32xf32> to vector<32xf32>
    %25 = vector.shape_cast %24 : vector<32xf32> to vector<1x32xf32>
    %26 = vector.extract_strided_slice %4 {offsets = [7, 0], sizes = [1, 32], strides = [1, 1]} : vector<10x32xf32> to vector<1x32xf32>
    %27 = vector.shape_cast %26 : vector<1x32xf32> to vector<32xf32>
    %28 = vector.shape_cast %27 : vector<32xf32> to vector<1x32xf32>
    %29 = vector.extract_strided_slice %4 {offsets = [8, 0], sizes = [1, 32], strides = [1, 1]} : vector<10x32xf32> to vector<1x32xf32>
    %30 = vector.shape_cast %29 : vector<1x32xf32> to vector<32xf32>
    %31 = vector.shape_cast %30 : vector<32xf32> to vector<1x32xf32>
    %32 = vector.extract_strided_slice %4 {offsets = [9, 0], sizes = [1, 32], strides = [1, 1]} : vector<10x32xf32> to vector<1x32xf32>
    %33 = vector.shape_cast %32 : vector<1x32xf32> to vector<32xf32>
    %34 = vector.shape_cast %33 : vector<32xf32> to vector<1x32xf32>
    %c0_3 = arith.constant 0 : index
    %c0_4 = arith.constant 0 : index
    %c0_5 = arith.constant 0 : index
    %35 = vector.load %arg18[%c0_3, %c0_4, %c0_5] : memref<2x8x32xf32, #tpu.memory_space<vmem>>, vector<2x8x32xf32>
    %36 = vector.shape_cast %35 : vector<2x8x32xf32> to vector<16x32xf32>
    %37 = arith.truncf %36 : vector<16x32xf32> to vector<16x32xbf16>
    %c0_6 = arith.constant 0 : index
    %c0_7 = arith.constant 0 : index
    %c0_8 = arith.constant 0 : index
    %38 = vector.load %arg4[%c0_6, %c0_7, %c0_8] : memref<1x32x32xbf16, #tpu.memory_space<vmem>>, vector<1x32x32xbf16>
    %39 = vector.shape_cast %38 : vector<1x32x32xbf16> to vector<32x32xbf16>
    %cst = arith.constant dense<0.000000e+00> : vector<16x32xf32>
    %40 = tpu.matmul %37, %39, %cst {dimension_numbers = #tpu.dot_dimension_numbers<[1], [0], [0], [1], [0, 0, 1, 1], [], []>} : vector<16x32xbf16>, vector<32x32xbf16>, vector<16x32xf32> -> vector<16x32xf32>
    %41 = vector.broadcast %7 : vector<1x32xf32> to vector<16x32xf32>
    %42 = arith.addf %40, %41 : vector<16x32xf32>
    %c0_9 = arith.constant 0 : index
    %c0_10 = arith.constant 0 : index
    %c0_11 = arith.constant 0 : index
    %43 = vector.load %arg5[%c0_9, %c0_10, %c0_11] : memref<1x32x32xbf16, #tpu.memory_space<vmem>>, vector<1x32x32xbf16>
    %44 = vector.shape_cast %43 : vector<1x32x32xbf16> to vector<32x32xbf16>
    %cst_12 = arith.constant dense<0.000000e+00> : vector<16x32xf32>
    %45 = tpu.matmul %37, %44, %cst_12 {dimension_numbers = #tpu.dot_dimension_numbers<[1], [0], [0], [1], [0, 0, 1, 1], [], []>} : vector<16x32xbf16>, vector<32x32xbf16>, vector<16x32xf32> -> vector<16x32xf32>
    %46 = vector.broadcast %10 : vector<1x32xf32> to vector<16x32xf32>
    %47 = arith.addf %45, %46 : vector<16x32xf32>
    %c0_13 = arith.constant 0 : index
    %c0_14 = arith.constant 0 : index
    %c0_15 = arith.constant 0 : index
    %48 = vector.load %arg6[%c0_13, %c0_14, %c0_15] : memref<1x32x32xbf16, #tpu.memory_space<vmem>>, vector<1x32x32xbf16>
    %49 = vector.shape_cast %48 : vector<1x32x32xbf16> to vector<32x32xbf16>
    %cst_16 = arith.constant dense<0.000000e+00> : vector<16x32xf32>
    %50 = tpu.matmul %37, %49, %cst_16 {dimension_numbers = #tpu.dot_dimension_numbers<[1], [0], [0], [1], [0, 0, 1, 1], [], []>} : vector<16x32xbf16>, vector<32x32xbf16>, vector<16x32xf32> -> vector<16x32xf32>
    %51 = vector.broadcast %13 : vector<1x32xf32> to vector<16x32xf32>
    %52 = arith.addf %50, %51 : vector<16x32xf32>
    %cst_17 = arith.constant 2.500000e-01 : f32
    %53 = vector.broadcast %cst_17 : f32 to vector<16x32xf32>
    %54 = arith.mulf %42, %53 : vector<16x32xf32>
    %55 = arith.truncf %54 : vector<16x32xf32> to vector<16x32xbf16>
    %56 = vector.shape_cast %55 : vector<16x32xbf16> to vector<2x8x32xbf16>
    %57 = arith.truncf %47 : vector<16x32xf32> to vector<16x32xbf16>
    %58 = vector.shape_cast %57 : vector<16x32xbf16> to vector<2x8x32xbf16>
    %59 = arith.truncf %52 : vector<16x32xf32> to vector<16x32xbf16>
    %60 = vector.shape_cast %59 : vector<16x32xbf16> to vector<2x8x32xbf16>
    %61 = vector.extract_strided_slice %56 {offsets = [0, 0, 0], sizes = [2, 8, 16], strides = [1, 1, 1]} : vector<2x8x32xbf16> to vector<2x8x16xbf16>
    %62 = vector.extract_strided_slice %58 {offsets = [0, 0, 0], sizes = [2, 8, 16], strides = [1, 1, 1]} : vector<2x8x32xbf16> to vector<2x8x16xbf16>
    %63 = vector.extract_strided_slice %60 {offsets = [0, 0, 0], sizes = [2, 8, 16], strides = [1, 1, 1]} : vector<2x8x32xbf16> to vector<2x8x16xbf16>
    "tpu.trace_start"() <{level = 10 : i32, message = "bqd,bkd->bqk"}> : () -> ()
    %cst_18 = arith.constant dense<0.000000e+00> : vector<2x8x8xf32>
    %64 = tpu.matmul %61, %62, %cst_18 {dimension_numbers = #tpu.dot_dimension_numbers<[2], [2], [1], [1], [0, 0, 0, 1, 1, 1], [0], [0]>} : vector<2x8x16xbf16>, vector<2x8x16xbf16>, vector<2x8x8xf32> -> vector<2x8x8xf32>
    "tpu.trace_stop"() : () -> ()
    %cst_19 = arith.constant dense<0xFF800000> : vector<2x8xf32>
    %65 = vector.multi_reduction <maximumf>, %64, %cst_19 [2] : vector<2x8x8xf32> to vector<2x8xf32>
    %66 = vector.shape_cast %65 : vector<2x8xf32> to vector<2x8x1xf32>
    %67 = vector.broadcast %66 : vector<2x8x1xf32> to vector<2x8x8xf32>
    %68 = arith.subf %64, %67 : vector<2x8x8xf32>
    %69 = math.exp %68 : vector<2x8x8xf32>
    %cst_20 = arith.constant dense<0.000000e+00> : vector<2x8xf32>
    %70 = vector.multi_reduction <add>, %69, %cst_20 [2] : vector<2x8x8xf32> to vector<2x8xf32>
    %71 = vector.shape_cast %70 : vector<2x8xf32> to vector<2x8x1xf32>
    %72 = tpu.reciprocal %71 {approx = true} : vector<2x8x1xf32> -> vector<2x8x1xf32>
    %73 = vector.broadcast %72 : vector<2x8x1xf32> to vector<2x8x8xf32>
    %74 = arith.mulf %69, %73 : vector<2x8x8xf32>
    %75 = arith.truncf %74 : vector<2x8x8xf32> to vector<2x8x8xbf16>
    "tpu.trace_start"() <{level = 10 : i32, message = "bqk,bkd->bqd"}> : () -> ()
    %cst_21 = arith.constant dense<0.000000e+00> : vector<2x8x16xf32>
    %76 = tpu.matmul %75, %63, %cst_21 {dimension_numbers = #tpu.dot_dimension_numbers<[2], [1], [1], [2], [0, 0, 0, 1, 1, 2], [0], [0]>} : vector<2x8x8xbf16>, vector<2x8x16xbf16>, vector<2x8x16xf32> -> vector<2x8x16xf32>
    "tpu.trace_stop"() : () -> ()
    %77 = vector.extract_strided_slice %56 {offsets = [0, 0, 16], sizes = [2, 8, 16], strides = [1, 1, 1]} : vector<2x8x32xbf16> to vector<2x8x16xbf16>
    %78 = vector.extract_strided_slice %58 {offsets = [0, 0, 16], sizes = [2, 8, 16], strides = [1, 1, 1]} : vector<2x8x32xbf16> to vector<2x8x16xbf16>
    %79 = vector.extract_strided_slice %60 {offsets = [0, 0, 16], sizes = [2, 8, 16], strides = [1, 1, 1]} : vector<2x8x32xbf16> to vector<2x8x16xbf16>
    "tpu.trace_start"() <{level = 10 : i32, message = "bqd,bkd->bqk"}> : () -> ()
    %cst_22 = arith.constant dense<0.000000e+00> : vector<2x8x8xf32>
    %80 = tpu.matmul %77, %78, %cst_22 {dimension_numbers = #tpu.dot_dimension_numbers<[2], [2], [1], [1], [0, 0, 0, 1, 1, 1], [0], [0]>} : vector<2x8x16xbf16>, vector<2x8x16xbf16>, vector<2x8x8xf32> -> vector<2x8x8xf32>
    "tpu.trace_stop"() : () -> ()
    %cst_23 = arith.constant dense<0xFF800000> : vector<2x8xf32>
    %81 = vector.multi_reduction <maximumf>, %80, %cst_23 [2] : vector<2x8x8xf32> to vector<2x8xf32>
    %82 = vector.shape_cast %81 : vector<2x8xf32> to vector<2x8x1xf32>
    %83 = vector.broadcast %82 : vector<2x8x1xf32> to vector<2x8x8xf32>
    %84 = arith.subf %80, %83 : vector<2x8x8xf32>
    %85 = math.exp %84 : vector<2x8x8xf32>
    %cst_24 = arith.constant dense<0.000000e+00> : vector<2x8xf32>
    %86 = vector.multi_reduction <add>, %85, %cst_24 [2] : vector<2x8x8xf32> to vector<2x8xf32>
    %87 = vector.shape_cast %86 : vector<2x8xf32> to vector<2x8x1xf32>
    %88 = tpu.reciprocal %87 {approx = true} : vector<2x8x1xf32> -> vector<2x8x1xf32>
    %89 = vector.broadcast %88 : vector<2x8x1xf32> to vector<2x8x8xf32>
    %90 = arith.mulf %85, %89 : vector<2x8x8xf32>
    %91 = arith.truncf %90 : vector<2x8x8xf32> to vector<2x8x8xbf16>
    "tpu.trace_start"() <{level = 10 : i32, message = "bqk,bkd->bqd"}> : () -> ()
    %cst_25 = arith.constant dense<0.000000e+00> : vector<2x8x16xf32>
    %92 = tpu.matmul %91, %79, %cst_25 {dimension_numbers = #tpu.dot_dimension_numbers<[2], [1], [1], [2], [0, 0, 0, 1, 1, 2], [0], [0]>} : vector<2x8x8xbf16>, vector<2x8x16xbf16>, vector<2x8x16xf32> -> vector<2x8x16xf32>
    "tpu.trace_stop"() : () -> ()
    %93 = tpu.concatenate %76, %92 in 2 : vector<2x8x16xf32>, vector<2x8x16xf32> -> vector<2x8x32xf32>
    %94 = arith.truncf %93 : vector<2x8x32xf32> to vector<2x8x32xbf16>
    %c0_26 = arith.constant 0 : index
    %c0_27 = arith.constant 0 : index
    %c0_28 = arith.constant 0 : index
    %95 = vector.load %arg19[%c0_26, %c0_27, %c0_28] : memref<2x8x32xbf16, #tpu.memory_space<vmem>>, vector<2x8x32xbf16>
    tpu.vector_store %arg19[%c0_26, %c0_27, %c0_28], %94 {strides = array<i32>} : memref<2x8x32xbf16, #tpu.memory_space<vmem>>, vector<2x8x32xbf16>,
    %c0_29 = arith.constant 0 : index
    %c0_30 = arith.constant 0 : index
    %c0_31 = arith.constant 0 : index
    %96 = vector.load %arg19[%c0_29, %c0_30, %c0_31] : memref<2x8x32xbf16, #tpu.memory_space<vmem>>, vector<2x8x32xbf16>
    %97 = vector.shape_cast %96 : vector<2x8x32xbf16> to vector<16x32xbf16>
    %c0_32 = arith.constant 0 : index
    %c0_33 = arith.constant 0 : index
    %c0_34 = arith.constant 0 : index
    %98 = vector.load %arg7[%c0_32, %c0_33, %c0_34] : memref<1x32x32xbf16, #tpu.memory_space<vmem>>, vector<1x32x32xbf16>
    %99 = vector.shape_cast %98 : vector<1x32x32xbf16> to vector<32x32xbf16>
    %cst_35 = arith.constant dense<0.000000e+00> : vector<16x32xf32>
    %100 = tpu.matmul %97, %99, %cst_35 {dimension_numbers = #tpu.dot_dimension_numbers<[1], [0], [0], [1], [0, 0, 1, 1], [], []>} : vector<16x32xbf16>, vector<32x32xbf16>, vector<16x32xf32> -> vector<16x32xf32>
    %101 = vector.broadcast %16 : vector<1x32xf32> to vector<16x32xf32>
    %102 = arith.addf %100, %101 : vector<16x32xf32>
    %103 = arith.addf %36, %102 : vector<16x32xf32>
    %cst_36 = arith.constant dense<0.000000e+00> : vector<16xf32>
    %104 = vector.multi_reduction <add>, %103, %cst_36 [1] : vector<16x32xf32> to vector<16xf32>
    %105 = vector.shape_cast %104 : vector<16xf32> to vector<16x1xf32>
    %cst_37 = arith.constant 3.200000e+01 : f32
    %106 = vector.broadcast %cst_37 : f32 to vector<16x1xf32>
    %107 = arith.divf %105, %106 : vector<16x1xf32>
    %108 = vector.broadcast %107 : vector<16x1xf32> to vector<16x32xf32>
    %109 = arith.subf %103, %108 : vector<16x32xf32>
    %110 = arith.mulf %109, %109 : vector<16x32xf32>
    %cst_38 = arith.constant dense<0.000000e+00> : vector<16xf32>
    %111 = vector.multi_reduction <add>, %110, %cst_38 [1] : vector<16x32xf32> to vector<16xf32>
    %112 = vector.shape_cast %111 : vector<16xf32> to vector<16x1xf32>
    %cst_39 = arith.constant 3.200000e+01 : f32
    %113 = vector.broadcast %cst_39 : f32 to vector<16x1xf32>
    %114 = arith.divf %112, %113 : vector<16x1xf32>
    %115 = vector.broadcast %107 : vector<16x1xf32> to vector<16x32xf32>
    %116 = arith.subf %103, %115 : vector<16x32xf32>
    %cst_40 = arith.constant 9.99999974E-6 : f32
    %117 = vector.broadcast %cst_40 : f32 to vector<16x1xf32>
    %118 = arith.addf %114, %117 : vector<16x1xf32>
    %119 = math.rsqrt %118 : vector<16x1xf32>
    %120 = vector.broadcast %119 : vector<16x1xf32> to vector<16x32xf32>
    %121 = arith.mulf %116, %120 : vector<16x32xf32>
    %122 = vector.broadcast %25 : vector<1x32xf32> to vector<16x32xf32>
    %123 = arith.mulf %121, %122 : vector<16x32xf32>
    %124 = vector.broadcast %28 : vector<1x32xf32> to vector<16x32xf32>
    %125 = arith.addf %123, %124 : vector<16x32xf32>
    %126 = arith.truncf %125 : vector<16x32xf32> to vector<16x32xbf16>
    %c0_41 = arith.constant 0 : index
    %c0_42 = arith.constant 0 : index
    %c0_43 = arith.constant 0 : index
    %127 = vector.load %arg8[%c0_41, %c0_42, %c0_43] : memref<1x32x32xbf16, #tpu.memory_space<vmem>>, vector<1x32x32xbf16>
    %128 = vector.shape_cast %127 : vector<1x32x32xbf16> to vector<32x32xbf16>
    %cst_44 = arith.constant dense<0.000000e+00> : vector<16x32xf32>
    %129 = tpu.matmul %126, %128, %cst_44 {dimension_numbers = #tpu.dot_dimension_numbers<[1], [0], [0], [1], [0, 0, 1, 1], [], []>} : vector<16x32xbf16>, vector<32x32xbf16>, vector<16x32xf32> -> vector<16x32xf32>
    %130 = vector.broadcast %19 : vector<1x32xf32> to vector<16x32xf32>
    %131 = arith.addf %129, %130 : vector<16x32xf32>
    %cst_45 = arith.constant 0.000000e+00 : f32
    %132 = vector.broadcast %cst_45 : f32 to vector<16x32xf32>
    %133 = arith.maximumf %131, %132 : vector<16x32xf32>
    %134 = arith.truncf %133 : vector<16x32xf32> to vector<16x32xbf16>
    %c0_46 = arith.constant 0 : index
    %c0_47 = arith.constant 0 : index
    %c0_48 = arith.constant 0 : index
    %135 = vector.load %arg9[%c0_46, %c0_47, %c0_48] : memref<1x32x32xbf16, #tpu.memory_space<vmem>>, vector<1x32x32xbf16>
    %136 = vector.shape_cast %135 : vector<1x32x32xbf16> to vector<32x32xbf16>
    %cst_49 = arith.constant dense<0.000000e+00> : vector<16x32xf32>
    %137 = tpu.matmul %134, %136, %cst_49 {dimension_numbers = #tpu.dot_dimension_numbers<[1], [0], [0], [1], [0, 0, 1, 1], [], []>} : vector<16x32xbf16>, vector<32x32xbf16>, vector<16x32xf32> -> vector<16x32xf32>
    %138 = vector.broadcast %22 : vector<1x32xf32> to vector<16x32xf32>
    %139 = arith.addf %137, %138 : vector<16x32xf32>
    %140 = arith.addf %125, %139 : vector<16x32xf32>
    %cst_50 = arith.constant dense<0.000000e+00> : vector<16xf32>
    %141 = vector.multi_reduction <add>, %140, %cst_50 [1] : vector<16x32xf32> to vector<16xf32>
    %142 = vector.shape_cast %141 : vector<16xf32> to vector<16x1xf32>
    %cst_51 = arith.constant 3.200000e+01 : f32
    %143 = vector.broadcast %cst_51 : f32 to vector<16x1xf32>
    %144 = arith.divf %142, %143 : vector<16x1xf32>
    %145 = vector.broadcast %144 : vector<16x1xf32> to vector<16x32xf32>
    %146 = arith.subf %140, %145 : vector<16x32xf32>
    %147 = arith.mulf %146, %146 : vector<16x32xf32>
    %cst_52 = arith.constant dense<0.000000e+00> : vector<16xf32>
    %148 = vector.multi_reduction <add>, %147, %cst_52 [1] : vector<16x32xf32> to vector<16xf32>
    %149 = vector.shape_cast %148 : vector<16xf32> to vector<16x1xf32>
    %cst_53 = arith.constant 3.200000e+01 : f32
    %150 = vector.broadcast %cst_53 : f32 to vector<16x1xf32>
    %151 = arith.divf %149, %150 : vector<16x1xf32>
    %152 = vector.broadcast %144 : vector<16x1xf32> to vector<16x32xf32>
    %153 = arith.subf %140, %152 : vector<16x32xf32>
    %cst_54 = arith.constant 9.99999974E-6 : f32
    %154 = vector.broadcast %cst_54 : f32 to vector<16x1xf32>
    %155 = arith.addf %151, %154 : vector<16x1xf32>
    %156 = math.rsqrt %155 : vector<16x1xf32>
    %157 = vector.broadcast %156 : vector<16x1xf32> to vector<16x32xf32>
    %158 = arith.mulf %153, %157 : vector<16x32xf32>
    %159 = vector.broadcast %31 : vector<1x32xf32> to vector<16x32xf32>
    %160 = arith.mulf %158, %159 : vector<16x32xf32>
    %161 = vector.broadcast %34 : vector<1x32xf32> to vector<16x32xf32>
    %162 = arith.addf %160, %161 : vector<16x32xf32>
    %163 = vector.shape_cast %162 : vector<16x32xf32> to vector<2x8x32xf32>
    %c0_55 = arith.constant 0 : index
    %c0_56 = arith.constant 0 : index
    %c0_57 = arith.constant 0 : index
    %164 = vector.load %arg18[%c0_55, %c0_56, %c0_57] : memref<2x8x32xf32, #tpu.memory_space<vmem>>, vector<2x8x32xf32>
    tpu.vector_store %arg18[%c0_55, %c0_56, %c0_57], %163 {strides = array<i32>} : memref<2x8x32xf32, #tpu.memory_space<vmem>>, vector<2x8x32xf32>,
    %c1_i32 = arith.constant 1 : i32
    %165 = arith.cmpi eq, %arg1, %c1_i32 : i32
    %166 = arith.extui %165 : i1 to i32
    %c0_i32_58 = arith.constant 0 : i32
    %167 = arith.cmpi ne, %166, %c0_i32_58 : i32
    scf.if %167 {
      %c0_59 = arith.constant 0 : index
      %c0_60 = arith.constant 0 : index
      %168 = vector.load %arg11[%c0_59, %c0_60] : memref<1x32xf32, #tpu.memory_space<vmem>>, vector<1x32xf32>
      %c0_61 = arith.constant 0 : index
      %c0_62 = arith.constant 0 : index
      %169 = vector.load %arg12[%c0_61, %c0_62] : memref<1x32xf32, #tpu.memory_space<vmem>>, vector<1x32xf32>
      %cst_63 = arith.constant dense<0.000000e+00> : vector<16xf32>
      %170 = vector.multi_reduction <add>, %162, %cst_63 [1] : vector<16x32xf32> to vector<16xf32>
      %171 = vector.shape_cast %170 : vector<16xf32> to vector<16x1xf32>
      %cst_64 = arith.constant 3.200000e+01 : f32
      %172 = vector.broadcast %cst_64 : f32 to vector<16x1xf32>
      %173 = arith.divf %171, %172 : vector<16x1xf32>
      %174 = vector.broadcast %173 : vector<16x1xf32> to vector<16x32xf32>
      %175 = arith.subf %162, %174 : vector<16x32xf32>
      %176 = arith.mulf %175, %175 : vector<16x32xf32>
      %cst_65 = arith.constant dense<0.000000e+00> : vector<16xf32>
      %177 = vector.multi_reduction <add>, %176, %cst_65 [1] : vector<16x32xf32> to vector<16xf32>
      %178 = vector.shape_cast %177 : vector<16xf32> to vector<16x1xf32>
      %cst_66 = arith.constant 3.200000e+01 : f32
      %179 = vector.broadcast %cst_66 : f32 to vector<16x1xf32>
      %180 = arith.divf %178, %179 : vector<16x1xf32>
      %181 = vector.broadcast %173 : vector<16x1xf32> to vector<16x32xf32>
      %182 = arith.subf %162, %181 : vector<16x32xf32>
      %cst_67 = arith.constant 9.99999974E-6 : f32
      %183 = vector.broadcast %cst_67 : f32 to vector<16x1xf32>
      %184 = arith.addf %180, %183 : vector<16x1xf32>
      %185 = math.rsqrt %184 : vector<16x1xf32>
      %186 = vector.broadcast %185 : vector<16x1xf32> to vector<16x32xf32>
      %187 = arith.mulf %182, %186 : vector<16x32xf32>
      %188 = vector.broadcast %168 : vector<1x32xf32> to vector<16x32xf32>
      %189 = arith.mulf %187, %188 : vector<16x32xf32>
      %190 = vector.broadcast %169 : vector<1x32xf32> to vector<16x32xf32>
      %191 = arith.addf %189, %190 : vector<16x32xf32>
      %192 = arith.truncf %191 : vector<16x32xf32> to vector<16x32xbf16>
      %c0_68 = arith.constant 0 : index
      %c0_69 = arith.constant 0 : index
      %193 = vector.load %arg13[%c0_68, %c0_69] : memref<32x128xbf16, #tpu.memory_space<vmem>>, vector<32x128xbf16>
      %cst_70 = arith.constant dense<0.000000e+00> : vector<16x128xf32>
      %194 = tpu.matmul %192, %193, %cst_70 {dimension_numbers = #tpu.dot_dimension_numbers<[1], [0], [0], [1], [0, 0, 1, 1], [], []>} : vector<16x32xbf16>, vector<32x128xbf16>, vector<16x128xf32> -> vector<16x128xf32>
      %c0_71 = arith.constant 0 : index
      %c0_72 = arith.constant 0 : index
      %195 = vector.load %arg14[%c0_71, %c0_72] : memref<1x128xf32, #tpu.memory_space<vmem>>, vector<1x128xf32>
      %196 = vector.broadcast %195 : vector<1x128xf32> to vector<16x128xf32>
      %197 = arith.addf %194, %196 : vector<16x128xf32>
      %cst_73 = arith.constant 0.000000e+00 : f32
      %198 = vector.broadcast %cst_73 : f32 to vector<16x128xf32>
      %199 = arith.maximumf %197, %198 : vector<16x128xf32>
      %200 = arith.truncf %199 : vector<16x128xf32> to vector<16x128xbf16>
      %c0_74 = arith.constant 0 : index
      %c0_75 = arith.constant 0 : index
      %201 = vector.load %arg15[%c0_74, %c0_75] : memref<128x128xbf16, #tpu.memory_space<vmem>>, vector<128x128xbf16>
      %cst_76 = arith.constant dense<0.000000e+00> : vector<16x128xf32>
      %202 = tpu.matmul %200, %201, %cst_76 {dimension_numbers = #tpu.dot_dimension_numbers<[1], [0], [0], [1], [0, 0, 1, 1], [], []>} : vector<16x128xbf16>, vector<128x128xbf16>, vector<16x128xf32> -> vector<16x128xf32>
      %c0_77 = arith.constant 0 : index
      %c0_78 = arith.constant 0 : index
      %203 = vector.load %arg16[%c0_77, %c0_78] : memref<1x128xf32, #tpu.memory_space<vmem>>, vector<1x128xf32>
      %204 = vector.broadcast %203 : vector<1x128xf32> to vector<16x128xf32>
      %205 = arith.addf %202, %204 : vector<16x128xf32>
      %cst_79 = arith.constant dense<0xFF800000> : vector<16xf32>
      %206 = vector.multi_reduction <maximumf>, %205, %cst_79 [1] : vector<16x128xf32> to vector<16xf32>
      %207 = vector.shape_cast %206 : vector<16xf32> to vector<16x1xf32>
      %208 = vector.broadcast %207 : vector<16x1xf32> to vector<16x128xf32>
      %209 = arith.subf %205, %208 : vector<16x128xf32>
      %210 = math.exp %209 : vector<16x128xf32>
      %cst_80 = arith.constant dense<0.000000e+00> : vector<16xf32>
      %211 = vector.multi_reduction <add>, %210, %cst_80 [1] : vector<16x128xf32> to vector<16xf32>
      %212 = vector.shape_cast %211 : vector<16xf32> to vector<16x1xf32>
      %213 = math.log %212 : vector<16x1xf32>
      %214 = arith.addf %213, %207 : vector<16x1xf32>
      %215 = vector.broadcast %214 : vector<16x1xf32> to vector<16x128xf32>
      %216 = arith.subf %205, %215 : vector<16x128xf32>
      %217 = vector.shape_cast %216 : vector<16x128xf32> to vector<2x8x128xf32>
      %c0_81 = arith.constant 0 : index
      %c0_82 = arith.constant 0 : index
      %c0_83 = arith.constant 0 : index
      %218 = vector.load %arg17[%c0_81, %c0_82, %c0_83] : memref<2x8x128xf32, #tpu.memory_space<vmem>>, vector<2x8x128xf32>
      tpu.vector_store %arg17[%c0_81, %c0_82, %c0_83], %217 {strides = array<i32>} : memref<2x8x128xf32, #tpu.memory_space<vmem>>, vector<2x8x128xf32>,
    } else {
    }
    return
  }
  func.func @transform_0(%arg0: i32, %arg1: i32) -> (i32, i32, i32) {
    %c0_i32 = arith.constant 0 : i32
    %c0_i32_0 = arith.constant 0 : i32
    %c0_i32_1 = arith.constant 0 : i32
    return %arg0, %c0_i32, %c0_i32_0 : i32, i32, i32
  }
  func.func @transform_1(%arg0: i32, %arg1: i32) -> (i32, i32) {
    %c0_i32 = arith.constant 0 : i32
    %c0_i32_0 = arith.constant 0 : i32
    %c0_i32_1 = arith.constant 0 : i32
    return %c0_i32, %c0_i32_0 : i32, i32
  }
  func.func @transform_2(%arg0: i32, %arg1: i32) -> (i32, i32, i32) {
    %c0_i32 = arith.constant 0 : i32
    %c0_i32_0 = arith.constant 0 : i32
    %c0_i32_1 = arith.constant 0 : i32
    return %arg1, %c0_i32, %c0_i32_0 : i32, i32, i32
  }
  func.func @transform_3(%arg0: i32, %arg1: i32) -> (i32, i32, i32) {
    %c0_i32 = arith.constant 0 : i32
    %c0_i32_0 = arith.constant 0 : i32
    %c0_i32_1 = arith.constant 0 : i32
    return %arg1, %c0_i32, %c0_i32_0 : i32, i32, i32
  }
  func.func @transform_4(%arg0: i32, %arg1: i32) -> (i32, i32, i32) {
    %c0_i32 = arith.constant 0 : i32
    %c0_i32_0 = arith.constant 0 : i32
    %c0_i32_1 = arith.constant 0 : i32
    return %arg1, %c0_i32, %c0_i32_0 : i32, i32, i32
  }
  func.func @transform_5(%arg0: i32, %arg1: i32) -> (i32, i32, i32) {
    %c0_i32 = arith.constant 0 : i32
    %c0_i32_0 = arith.constant 0 : i32
    %c0_i32_1 = arith.constant 0 : i32
    return %arg1, %c0_i32, %c0_i32_0 : i32, i32, i32
  }
  func.func @transform_6(%arg0: i32, %arg1: i32) -> (i32, i32, i32) {
    %c0_i32 = arith.constant 0 : i32
    %c0_i32_0 = arith.constant 0 : i32
    %c0_i32_1 = arith.constant 0 : i32
    return %arg1, %c0_i32, %c0_i32_0 : i32, i32, i32
  }
  func.func @transform_7(%arg0: i32, %arg1: i32) -> (i32, i32, i32) {
    %c0_i32 = arith.constant 0 : i32
    %c0_i32_0 = arith.constant 0 : i32
    %c0_i32_1 = arith.constant 0 : i32
    return %arg1, %c0_i32, %c0_i32_0 : i32, i32, i32
  }
  func.func @transform_8(%arg0: i32, %arg1: i32) -> (i32, i32, i32) {
    %c0_i32 = arith.constant 0 : i32
    %c0_i32_0 = arith.constant 0 : i32
    %c0_i32_1 = arith.constant 0 : i32
    return %arg1, %c0_i32, %c0_i32_0 : i32, i32, i32
  }
  func.func @transform_9(%arg0: i32, %arg1: i32) -> (i32, i32) {
    %c0_i32 = arith.constant 0 : i32
    %c0_i32_0 = arith.constant 0 : i32
    %c0_i32_1 = arith.constant 0 : i32
    return %c0_i32, %c0_i32_0 : i32, i32
  }
  func.func @transform_10(%arg0: i32, %arg1: i32) -> (i32, i32) {
    %c0_i32 = arith.constant 0 : i32
    %c0_i32_0 = arith.constant 0 : i32
    %c0_i32_1 = arith.constant 0 : i32
    return %c0_i32, %c0_i32_0 : i32, i32
  }
  func.func @transform_11(%arg0: i32, %arg1: i32) -> (i32, i32) {
    %c0_i32 = arith.constant 0 : i32
    %c0_i32_0 = arith.constant 0 : i32
    %c0_i32_1 = arith.constant 0 : i32
    return %c0_i32, %c0_i32_0 : i32, i32
  }
  func.func @transform_12(%arg0: i32, %arg1: i32) -> (i32, i32) {
    %c0_i32 = arith.constant 0 : i32
    %c0_i32_0 = arith.constant 0 : i32
    %c0_i32_1 = arith.constant 0 : i32
    return %c0_i32, %c0_i32_0 : i32, i32
  }
  func.func @transform_13(%arg0: i32, %arg1: i32) -> (i32, i32) {
    %c0_i32 = arith.constant 0 : i32
    %c0_i32_0 = arith.constant 0 : i32
    %c0_i32_1 = arith.constant 0 : i32
    return %c0_i32, %c0_i32_0 : i32, i32
  }
  func.func @transform_14(%arg0: i32, %arg1: i32) -> (i32, i32) {
    %c0_i32 = arith.constant 0 : i32
    %c0_i32_0 = arith.constant 0 : i32
    %c0_i32_1 = arith.constant 0 : i32
    return %c0_i32, %c0_i32_0 : i32, i32
  }
  func.func @transform_15(%arg0: i32, %arg1: i32) -> (i32, i32, i32) {
    %c0_i32 = arith.constant 0 : i32
    %c0_i32_0 = arith.constant 0 : i32
    %c0_i32_1 = arith.constant 0 : i32
    return %arg0, %c0_i32, %c0_i32_0 : i32, i32, i32
  }
}

</mosaic_0001>

<bundles_post_ra>
// kernel: tpu_custom_call.1
= control target key start
LH: loop header
LB: loop body
LE: loop exit
PB: predicated region body
PF: predicated region fallthrough
CT: control target
= control target key end

     0   :  { %s3495_s0 = inlined_call_operand.hbm [shape: f32[4,8,16], index: 0, kind: input, shape index: {}]   ;;  %s3496_s1 = inlined_call_operand.hbm [shape: f32[8,16], index: 1, kind: input, shape index: {}]   ;;  %s3497_s2 = inlined_call_operand.hbm [shape: bf16[2,32,32], index: 2, kind: input, shape index: {}]   ;;  %s3498_s3 = inlined_call_operand.hbm [shape: bf16[2,32,32], index: 3, kind: input, shape index: {}]   ;;  %s3499_s4 = inlined_call_operand.hbm [shape: bf16[2,32,32], index: 4, kind: input, shape index: {}]   ;;  %s3500_s5 = inlined_call_operand.hbm [shape: bf16[2,32,32], index: 5, kind: input, shape index: {}]   ;;  %s3501_s6 = inlined_call_operand.hbm [shape: bf16[2,32,32], index: 6, kind: input, shape index: {}]   ;;  %s3502_s7 = inlined_call_operand.hbm [shape: bf16[2,32,32], index: 7, kind: input, shape index: {}]   ;;  %s3503_s8 = inlined_call_operand.vmem [shape: f32[2,10,32], index: 8, kind: input, shape index: {}]   ;;  %s3504_s9 = inlined_call_operand.hbm [shape: f32[1,32], index: 9, kind: input, shape index: {}]   ;;  %s3505_s10 = inlined_call_operand.hbm [shape: f32[1,32], index: 10, kind: input, shape index: {}]   ;;  %s3506_s11 = inlined_call_operand.hbm [shape: bf16[32,128], index: 11, kind: input, shape index: {}]   ;;  %s3507_s12 = inlined_call_operand.hbm [shape: f32[1,128], index: 12, kind: input, shape index: {}]   ;;  %s3508_s13 = inlined_call_operand.vmem [shape: bf16[128,128], index: 13, kind: input, shape index: {}]   ;;  %s3509_s14 = inlined_call_operand.vmem [shape: f32[1,128], index: 14, kind: input, shape index: {}]   ;;  %s3510_s15 = inlined_call_operand.hbm [shape: f32[4,8,128], index: 15, kind: output, shape index: {}]  }
   0x1   :  { %3528 = sst [smem:[#allocation40_spill]] %s3495_s0 }
   0x2   :  { %3529 = sst [smem:[#allocation41_spill]] %s3496_s1 }
   0x3   :  { %3530 = sst [smem:[#allocation42_spill]] %s3497_s2 }
   0x4   :  { %3531 = sst [smem:[#allocation43_spill]] %s3498_s3 }
   0x5   :  { %3532 = sst [smem:[#allocation44_spill]] %s3499_s4 }
   0x6   :  { %3533 = sst [smem:[#allocation45_spill]] %s3500_s5 }
   0x7   :  { %3534 = sst [smem:[#allocation46_spill]] %s3502_s7 }
   0x8   :  { %3535 = sst [smem:[#allocation47_spill]] %s3503_s8 }
   0x9   :  { %3536 = sst [smem:[#allocation48_spill]] %s3505_s10 }
   0xa   :  { %3537 = sst [smem:[#allocation49_spill]] %s3506_s11 }
   0xb   :  { %3538 = sst [smem:[#allocation50_spill]] %s3507_s12 }
   0xc   :  { %3539 = sst [smem:[#allocation51_spill]] %s3508_s13 }
   0xd   :  { %3540 = sst [smem:[#allocation52_spill]] %s3509_s14 }
   0xe   :  { %3541 = sst [smem:[#allocation53_spill]] %s3510_s15 }
   0xf   :  { %20 = vsyncpa [#allocation5], 0 }
  0x10   :  { %22 = vsyncpa [#allocation5 + $0x1], 0 }
  0x11   :  { %23 = vsyncpa [#allocation8], 0 }
  0x12   :  { %24 = vsyncpa [#allocation17], 0 }
  0x13   :  { %25 = vsyncpa [#allocation20], 0 }
  0x14   :  { %26 = vsyncpa [#allocation6], 0 }
  0x15   :  { %28 = vsyncpa [#allocation6 + $0x1], 0  ;;  %s2978_s18 = smov 0   ;;  %s2980_s19 = smov 0  }
  0x16   :  { %s2982_s20 = smov 0   ;;  %s2984_s21 = smov 0  }
  0x17   :  { %s2986_s22 = smov 0   ;;  %s2988_s23 = smov 0  }
  0x18   :  { %s2990_s24 = smov 0   ;;  %s2992_s25 = smov 0  }
  0x19   :  { %s2994_s26 = smov 0   ;;  %s2996_s27 = smov 0  }
  0x1a   :  { %s2998_s28 = smov 0  }
  0x1b LB: > { %3542 = sst [smem:[#allocation29_spill]] %s2845_s19  ;;  %s3034_s29 = sadd.s32 4294967295, %s2881_s28   ;;  %s2881_s28 = sphi %s2998_s28, %s34_s28   ;;  %s2877_s27 = sphi %s2996_s27, %s3599_s27   ;;  %s2873_s26 = sphi %s2994_s26, %s3598_s26   ;;  %s2869_s25 = sphi %s2992_s25, %s3597_s25   ;;  %s2865_s24 = sphi %s2990_s24, %s3596_s24   ;;  %s2861_s23 = sphi %s2988_s23, %s3589_s23   ;;  %s2857_s22 = sphi %s2986_s22, %s3595_s22   ;;  %s2853_s21 = sphi %s2984_s21, %s3594_s21   ;;  %s2849_s20 = sphi %s2982_s20, %s3593_s20   ;;  %s2845_s19 = sphi %s2980_s19, %s3592_s19   ;;  %s2841_s18 = sphi %s2978_s18, %s3586_s18  }
  0x1c   : > { %3543 = sst [smem:[#allocation30_spill]] %s2861_s23  ;;  %s1948_s30 = sadd.s32 4294967294, %s2881_s28  }
  0x1d   : > { %3544 = sst [smem:[#allocation31_spill]] %s2865_s24  ;;  %s43_s16 = sadd.s32 1, %s2873_s26 }
  0x1e   : > { %3545 = sst [smem:[#allocation32_spill]] %s2869_s25  ;;  %s46_s17 = sadd.s32 1, %s2877_s27 }
  0x1f   : > { %p44_p0 = scmp.ge.s32.totalorder %s43_s16, 2  ;;  %s53_s15 = sadd.s32 1, %s2861_s23 }
  0x20   : > { %p60_p1 = scmp.ne.s32.totalorder %s2861_s23, %s2857_s22  ;;  %p61_p2 = scmp.eq.s32.totalorder %s2881_s28, 0 }
  0x21   : > { %s3601_s16 = smov (%p44_p0, %s43_s16), 0  ;;  %s3603_s17 = smov (!%p44_p0, %s46_s17), %s2877_s27 }
  0x22   : > { %3546 = sst [smem:[#allocation33_spill]] %s3601_s16  ;;  %p3051_p3 = por %p61_p2, %p60_p1 }
  0x23   : > { %p3515_p4 = scmp.ne.s32.totalorder %s2857_s22, %s2853_s21  ;;  %p48_p5 = scmp.ge.s32.totalorder %s3603_s17, 2 }
  0x24   : > { %p67_p6 = scmp.eq.s32.totalorder %s3034_s29, 0  ;;  %s97_s14 = ssub.s32 %s2873_s26, %s3601_s16 }
  0x25   : > { %s100_s13 = sadd.s32 1, %s2849_s20  ;;  %s3605_s17 = smov (%p48_p5, %s3603_s17), 0 }
  0x26   : > { %3548 = sst [smem:[#allocation34_spill]] %s3605_s17  ;;  %p3068_p7 = por %p67_p6, %p3515_p4 }
  0x27   : > { %p98_p8 = scmp.eq.s32.totalorder %s97_s14, 0  ;;  %s50_s24 = ssub.s32 %s2877_s27, %s3605_s17 }
  0x28   : > { %s3549_s8 = scalar_select %p3068_p7, 1, 0 }
  0x29   : > { %p107_p9 = scmp.ne.s32.totalorder %s2849_s20, %s2845_s19  ;;  %p51_p10 = scmp.eq.s32.totalorder %s50_s24, 0 }
  0x2a   : > { %3550 = sst [smem:[#allocation35_spill]] %s3549_s8  ;;  %p113_p11 = scmp.ne.s32.totalorder %s2845_s19, %s2841_s18 }
  0x2b   : > { %s3079_s16 = scalar_select %p98_p8, %s2849_s20, %s100_s13  }
  0x2c   : > { %s3082_s7 = scalar_select %p51_p10, %s2861_s23, %s53_s15  }
  0x2d   : > { %3551 = sst [smem:[#allocation36_spill]] %s3079_s16  ;;  %p3086_p12 = por %p107_p9, %p61_p2 }
  0x2e   : > { %3552 = sst [smem:[#allocation37_spill]] %s3082_s7  ;;  %p3092_p13 = por %p113_p11, %p67_p6 }
  0x2f   : > { %p419_p0 = scmp.eq.s32.totalorder %s3034_s29, 3  ;;  %p425_p5 = scmp.eq.s32.totalorder %s1948_s30, 3 }
  0x30   : > { %s3554_s11 = scalar_select %p3092_p13, 1, 0 }
  0x31   : > { %p3100_p4 = por %p419_p0, %p60_p1  ;;  %p3557_p8 = scmp.ne.s32.totalorder %s2857_s22, %s2853_s21 }
  0x32   : > { %3555 = sst [smem:[#allocation38_spill]] %s3554_s11  ;;  %p2222_p2 = scmp.lt.s32.totalorder %s2881_s28, 4 }
  0x33   : > { %p3107_p10 = por %p425_p5, %p3557_p8  ;;  %s513_s15 = sand.u32 1, %s2881_s28  }
  0x34   : > { %s515_s18 = sand.u32 1, %s2861_s23   ;;  %s2107_s17 = sshll.u32 %s2877_s27, 4 }
  0x35   : > { %s3558_s14 = scalar_select %p3107_p10, 1, 0 }
  0x36   : > { %s1956_s24 = sshll.u32 %s515_s18, 4  ;;  %s3560_s0 = sld [smem:[#allocation40_spill]] }
  0x37   : > { %3559 = sst [smem:[#allocation39_spill]] %s3558_s14  ;;  %s517_s19 = scalar_lea.vmem [#allocation4], %s1956_s24 }
  0x38   : > { %s525_s8 = sshll.u32 %s517_s19, 4  ;;  %p2192_p1 = pnand %p2222_p2, %p3051_p3  ;;  %s526_s8 = int_to_ptr.vmem [resolvable:$true] %s525_s8 }
  0x39   : > { %p3122_p9 = pnand %p2222_p2, %p3086_p12  ;;  %s3126_s23 = scalar_lea.sflag [#allocation5], %s513_s15 }
  0x3a   : > { %s2883_s18 = smov 128   ;;  %s2884_s7 = smov 8  }
  0x3b   : > { %s537_s16 = sand.u32 1, %s2849_s20   ;;  %s3562_s2 = sld [smem:[#allocation42_spill]] }
  0x3c   : > { %s522_s30 = scalar_lea.hbm %s3560_s0, %s2107_s17  ;;  %s3131_s17 = sshll.u32 %s2873_s26, 4 }
  0x3d   : > { %s523_s11 = sshll.u32 %s522_s30, 4  ;;  %s3133_s19 = sshll.u32 %s537_s16, 4  ;;  %s524_s11 = int_to_ptr.hbm [resolvable:$true] %s523_s11 }
  0x3e   : > { %2194 = dma.hbm_to_vmem [thread:$0]  (!%p2192_p1), %s524_s11, 256, %s526_s8, %s3126_s23, %s2883_s18, %s2883_s18, %s2884_s7  }
  0x3f   : > { %s539_s8 = scalar_lea.vmem [#allocation9], %s3133_s19  ;;  %s3524_s30 = smov 64  }
  0x40   : > { %s547_s11 = sshll.u32 %s539_s8, 4  ;;  %s3526_s18 = smov 4   ;;  %s548_s11 = int_to_ptr.vmem [resolvable:$true] %s547_s11 }
  0x41   : > { %s544_s15 = scalar_lea.hbm %s3562_s2, %s3131_s17  ;;  %s3563_s3 = sld [smem:[#allocation43_spill]] }
  0x42   : > { %s545_s24 = sshll.u32 %s544_s15, 4  ;;  %s561_s25 = scalar_lea.vmem [#allocation10], %s3133_s19  ;;  %s546_s24 = int_to_ptr.hbm [resolvable:$true] %s545_s24 }
  0x43   : > { %2197 = dma.hbm_to_vmem [thread:$0]  (!%p3122_p9), %s546_s24, 256, %s548_s11, %s3126_s23, %s3524_s30, %s3524_s30, %s3526_s18  }
  0x44   : > { %s569_s15 = sshll.u32 %s561_s25, 4  ;;  %s3564_s4 = sld [smem:[#allocation44_spill]]  ;;  %s570_s15 = int_to_ptr.vmem [resolvable:$true] %s569_s15 }
  0x45   : > { %s583_s7 = scalar_lea.vmem [#allocation11], %s3133_s19  ;;  %s3565_s5 = sld [smem:[#allocation45_spill]] }
  0x46   : > { %s591_s16 = sshll.u32 %s583_s7, 4  ;;  %p1949_p3 = scmp.ge.s32.totalorder %s2881_s28, 1  ;;  %s592_s16 = int_to_ptr.vmem [resolvable:$true] %s591_s16 }
  0x47   : > { %s566_s12 = scalar_lea.hbm %s3563_s3, %s3131_s17  ;;  %p432_p11 = scmp.lt.s32.totalorder %s2881_s28, 5 }
  0x48   : > { %s567_s0 = sshll.u32 %s566_s12, 4  ;;  %s3566_s1 = sld [smem:[#allocation41_spill]]  ;;  %s568_s0 = int_to_ptr.hbm [resolvable:$true] %s567_s0 }
  0x49   : > { %2200 = dma.hbm_to_vmem [thread:$0]  (!%p3122_p9), %s568_s0, 256, %s570_s15, %s3126_s23, %s3524_s30, %s3524_s30, %s3526_s18  }
  0x4a   : > { %s588_s11 = scalar_lea.hbm %s3564_s4, %s3131_s17  ;;  %s605_s0 = scalar_lea.vmem [#allocation12], %s3133_s19 }
  0x4b   : > { %s589_s2 = sshll.u32 %s588_s11, 4  ;;  %s610_s3 = scalar_lea.hbm %s3565_s5, %s3131_s17  ;;  %s590_s2 = int_to_ptr.hbm [resolvable:$true] %s589_s2 }
  0x4c   : > { %2203 = dma.hbm_to_vmem [thread:$0]  (!%p3122_p9), %s590_s2, 256, %s592_s16, %s3126_s23, %s3524_s30, %s3524_s30, %s3526_s18  }
  0x4d   : > { %s613_s15 = sshll.u32 %s605_s0, 4  ;;  %s611_s8 = sshll.u32 %s610_s3, 4  ;;  %s614_s15 = int_to_ptr.vmem [resolvable:$true] %s613_s15  ;;  %s612_s8 = int_to_ptr.hbm [resolvable:$true] %s611_s8 }
  0x4e   : > { %2206 = dma.hbm_to_vmem [thread:$0]  (!%p3122_p9), %s612_s8, 256, %s614_s15, %s3126_s23, %s3524_s30, %s3524_s30, %s3526_s18  }
  0x4f   : > { %s444_s11 = sshll.u32 %s3566_s1, 4  ;;  %p3184_p12 = pnand %p1949_p3, %p432_p11  ;;  %s445_s11 = int_to_ptr.hbm [resolvable:$true] %s444_s11 }
  0x50   : > { %s2887_s3 = smov [#allocation7]   ;;  %s3568_s10 = sld [smem:[#allocation48_spill]] }
  0x51   : > { %s446_s16 = sshll.u32 %s2887_s3, 4  ;;  %p2175_p0 = pneg %p3184_p12  ;;  %s447_s16 = int_to_ptr.vmem [resolvable:$true] %s446_s16 }
  0x52   : > { %s2888_s8 = smov [#allocation16]   ;;  %s632_s12 = scalar_lea.hbm %s3501_s6, %s3131_s17 }
  0x53   : > { %p3195_p5 = pnand %p2175_p0, %p67_p6  ;;  %s470_s24 = sshll.u32 %s2888_s8, 4  ;;  %s471_s24 = int_to_ptr.vmem [resolvable:$true] %s470_s24 }
  0x54   : > { %s633_s25 = sshll.u32 %s632_s12, 4  ;;  %s627_s30 = scalar_lea.vmem [#allocation13], %s3133_s19  ;;  %s634_s25 = int_to_ptr.hbm [resolvable:$true] %s633_s25 }
  0x55   : > { %2178 = dma.hbm_to_vmem [thread:$0]  (!%p3195_p5), %s445_s11, 128, %s447_s16, [#allocation8]  }
  0x56   : > { %s468_s0 = sshll.u32 %s3568_s10, 4  ;;  %s635_s18 = sshll.u32 %s627_s30, 4  ;;  %s469_s0 = int_to_ptr.hbm [resolvable:$true] %s468_s0  ;;  %s636_s18 = int_to_ptr.vmem [resolvable:$true] %s635_s18 }
  0x57   : > { %2184 = dma.hbm_to_vmem [thread:$0]  (!%p3195_p5), %s469_s0, 16, %s471_s24, [#allocation17]  }
  0x58   : > { %s456_s8 = sshll.u32 %s3504_s9, 4  ;;  %s3570_s5 = smov 4   ;;  %s457_s8 = int_to_ptr.hbm [resolvable:$true] %s456_s8 }
  0x59   : > { %s3571_s10 = smov 64   ;;  %s2889_s2 = smov [#allocation15]  }
  0x5a   : > { %2209 = dma.hbm_to_vmem [thread:$0]  (!%p3122_p9), %s634_s25, 256, %s636_s18, %s3126_s23, %s3571_s10, %s3571_s10, %s3570_s5  }
  0x5b   : > { %s458_s11 = sshll.u32 %s2889_s2, 4  ;;  %s3572_s24 = sld [smem:[#allocation49_spill]]  ;;  %s459_s11 = int_to_ptr.vmem [resolvable:$true] %s458_s11 }
  0x5c   : > { %2181 = dma.hbm_to_vmem [thread:$0]  (!%p3195_p5), %s457_s8, 16, %s459_s11, [#allocation8]  }
  0x5d   : > { %s3573_s3 = sld [smem:[#allocation50_spill]]  ;;  %s2890_s18 = smov [#allocation18]  }
  0x5e   : > { %s481_s25 = sshll.u32 %s2890_s18, 4  ;;  %s2891_s2 = smov [#allocation19]   ;;  %s482_s25 = int_to_ptr.vmem [resolvable:$true] %s481_s25 }
  0x5f   : > { %s496_s16 = sshll.u32 %s2891_s2, 4  ;;  %s3574_s11 = sld [smem:[#allocation46_spill]]  ;;  %s497_s16 = int_to_ptr.vmem [resolvable:$true] %s496_s16 }
  0x60   : > { %s649_s4 = scalar_lea.vmem [#allocation14], %s3133_s19  ;;  %s681_s15 = sand.u32 (!%p3184_p12), 1, %s2857_s22  }
  0x61   : > { %s479_s30 = sshll.u32 %s3572_s24, 4  ;;  %s480_s30 = int_to_ptr.hbm [resolvable:$true] %s479_s30 }
  0x62   : > { %2187 = dma.hbm_to_vmem [thread:$0]  (!%p3195_p5), %s480_s30, 256, %s482_s25, [#allocation17], %s3571_s10, %s3571_s10, %s3570_s5  }
  0x63   : > { %s494_s12 = sshll.u32 %s3573_s3, 4  ;;  %s657_s3 = sshll.u32 %s649_s4, 4  ;;  %s495_s12 = int_to_ptr.hbm [resolvable:$true] %s494_s12  ;;  %s658_s3 = int_to_ptr.vmem [resolvable:$true] %s657_s3 }
  0x64   : > { %2190 = dma.hbm_to_vmem [thread:$0]  (!%p3195_p5), %s495_s12, 16, %s497_s16, [#allocation20]  }
  0x65   : > { %s654_s24 = scalar_lea.hbm %s3574_s11, %s3131_s17  ;;  %677 = sbr.rel (%p3184_p12) target bundleno = 2980 (0xba4), region = 80 }
  0x66   : > { %s655_s1 = sshll.u32 %s654_s24, 4  ;;  %s679_s17 = sand.u32 (!%p3184_p12), 1, %s3034_s29   ;;  %s656_s1 = int_to_ptr.hbm [resolvable:$true] %s655_s1 }
  0x67   : > { %2212 = dma.hbm_to_vmem [thread:$0]  (!%p3122_p9), %s656_s1, 256, %s658_s3, %s3126_s23, %s3571_s10, %s3571_s10, %s3570_s5  }
  0x68   : > { %s3249_s12 = sshll.u32 (!%p3184_p12), %s681_s15, 4  ;;  %s680_s19 = scalar_lea.sflag (!%p3184_p12), [#allocation5], %s679_s17 }
  0x69   : > { %s683_s18 = scalar_lea.vmem (!%p3184_p12), [#allocation4], %s3249_s12 }
  0x6a   : > { %2812 = dma.done.wait (%p3068_p7), %s680_s19, 256  }
  0x6b   : > { %2814 = vsyncadd (%p3068_p7), %s680_s19, 4294967040 }
  0x6c   : > { %2816 = dma.done.wait (%p67_p6), [#allocation8], 128  }
  0x6d   : > { %2818 = vsyncadd (%p67_p6), [#allocation8], 4294967168  ;;  %s3576_s5 = sld [smem:[#allocation29_spill]] }
  0x73   : > { %s696_s23 = sand.u32 1, %s3576_s5  }
  0x74   : > { %s3261_s14 = sshll.u32 %s696_s23, 4 }
  0x75   : > { %s698_s7 = scalar_lea.vmem [#allocation9], %s3261_s14 }
  0x76   : > { %2820 = dma.done.wait (%p3092_p13), %s680_s19, 1536  }
  0x77   : > { %2822 = vsyncadd (%p3092_p13), %s680_s19, 4294965760  ;;  %s708_s25 = scalar_lea.vmem [#allocation10], %s3261_s14  ;;  %s718_s2 = scalar_lea.vmem [#allocation11], %s3261_s14 }
  0x78   : > { %s728_s16 = scalar_lea.vmem [#allocation12], %s3261_s14  ;;  %s738_s0 = scalar_lea.vmem [#allocation13], %s3261_s14 }
  0x79   : > { %s748_s8 = scalar_lea.vmem [#allocation14], %s3261_s14 }
  0x7a   : > { %2824 = dma.done.wait (%p67_p6), [#allocation8], 16  }
  0x7b   : > { %2826 = vsyncadd (%p67_p6), [#allocation8], 4294967280 }
  0x7c   : > { %2828 = dma.done.wait (%p67_p6), [#allocation17], 272  }
  0x7d   : > { %2830 = vsyncadd (%p67_p6), [#allocation17], 4294967024 }
  0x7e   : > { %2832 = dma.done.wait (%p67_p6), [#allocation20], 16  }
  0x7f   : > { %2834 = vsyncadd (%p67_p6), [#allocation20], 4294967280  ;;  %s3578_s11 = sld [smem:[#allocation31_spill]]  ;;  %s3293_s19 = scalar_lea.vmem [#allocation21], %s3249_s12 }
  0x80   : > { %s3579_s30 = sld [smem:[#allocation47_spill]] }
  0x85   : > { %p852_p7 = scmp.lt.s32.totalorder %s3578_s11, 1  ;;  %p1993_p13 = scmp.ne.s32.totalorder %s3578_s11, 0 }
  0x86   : > { %s2892_s29 = smov (!%p1993_p13), 16  }
  0x87   : > { %s853_s24 = scalar_select %p852_p7, %s3578_s11, 1 }
  0x88   : > { %862 = sbr.rel (%p1993_p13) target bundleno = 260 (0x104), region = 132 }
  0x89   : > { %s2114_s1 = sshll.u32 %s853_s24, 4 }
  0x8a   : > { %s3290_s17 = scalar_lea.vmem %s3579_s30, %s2114_s1 }
  0x8d   : > { %v863_v0 = vld [vmem:[#allocation7] sm:$0xff]  ;;  %v865_v2 = vld [vmem:[%s683_s18 + $0x8] sm:$0xff]  ;;  %vm870_vm0 = vcmask 130048   ;;  %vm873_vm1 = vcmask 261120  }
  0x8e   : > { %867 = vrot.lane.b32.xlu0 %v863_v0, %s2892_s29  ;;  %v864_v1 = vld [vmem:[%s683_s18] sm:$0xff] }
 0x100   : > { %v868_v3 = vpop.permute.xlu0 %867 }
 0x101   : > { %v871_v4 = vsel %vm870_vm0, %v864_v1, %v868_v3  ;;  %v872_v5 = vsel %vm870_vm0, %v865_v2, %v868_v3 }
 0x102   : > { %874 = vst.msk [vmem:[#allocation2] sm:$0xff] %vm873_vm1, %v871_v4 }
 0x103   : > { %875 = vst.msk [vmem:[#allocation2 + $0x8] sm:$0xff] %vm873_vm1, %v872_v5 }
 0x104 PF: > { %v2116_v6 = vld [vmem:[%s698_s7 + $0x8] sm:$0xff]  ;;  %v2115_v8 = vld [vmem:[%s698_s7] sm:$0xff]  ;;  %vm898_vm2 = vcmask 261120   ;;  %vm986_vm3 = vcmask 130048   ;;  %s2893_s12 = smov 112   ;;  %vm1025_vm4 = vcmask 64512  }
 0x105   : > { %v2118_v7 = vld [vmem:[%s708_s25 + $0x8] sm:$0xff]  ;;  %908 = vmatpush.bf16.msra.mxu0 %v2116_v6  ;;  %v2117_v9 = vld [vmem:[%s708_s25] sm:$0xff]  ;;  %vm1053_vm5 = vcmask 1043456   ;;  %s2894_s18 = smov 16   ;;  %vm1231_vm6 = vcmask 257024   ;;  %s3580_s5 = sld [smem:[#allocation31_spill]] }
 0x106   : > { %939 = vmatpush.bf16.msra.mxu1 %v2118_v7  ;;  %v3317_v13 = vld [vmem:[%s3290_s17] sm:$0xff]  ;;  %v2120_v42 = vld [vmem:[%s718_s2 + $0x8] sm:$0xff] }
 0x107   : > { %v885_v14 = vperm.slane %v3317_v13, 0  ;;  %v920_v15 = vperm.slane %v3317_v13, 1  ;;  %970 = vmatpush.bf16.msra.mxu2 %v2120_v42  ;;  %v2119_v43 = vld [vmem:[%s718_s2] sm:$0xff]  ;;  %v951_v6 = vperm.slane %v3317_v13, 2 }
 0x109   : > { %v3308_v10 = vld [vmem:[#allocation2] sm:$0xff]  ;;  %909 = vmatpush.bf16.msra.mxu0 %v2115_v8 }
 0x10a   : > { %v3310_v11 = vld [vmem:[#allocation2 + $0x8] sm:$0xff]  ;;  %940 = vmatpush.bf16.msra.mxu1 %v2117_v9 }
 0x10b   : > { %v880_v12 = vpack.c.bf16 %v3310_v11, %v3308_v10  ;;  %971 = vmatpush.bf16.msra.mxu2 %v2119_v43  ;;  %p2060_p6 = scmp.ne.s32.totalorder %s3580_s5, 1 }
 0x10c   : > { %s3581_s14 = sld [smem:[#allocation51_spill]] (!%p2060_p6) }
 0x10d   : > { %2002 = vmatmul.msk.bf16.vlgmr.msra.gmra.mxu0 %vm898_vm2, %v880_v12  ;;  %2011 = vmatmul.msk.bf16.vlgmr.msra.gmra.mxu1 %vm898_vm2, %v880_v12  ;;  %s3582_s5 = sld [smem:[#allocation52_spill]] (!%p2060_p6) }
 0x10e   : > { %2020 = vmatmul.msk.bf16.vlgmr.msra.gmra.mxu2 %vm898_vm2, %v880_v12 }
 0x18a   : > { %v911_v16 = vpop.f32.mrf.mxu0  ;;  %v942_v17 = vpop.f32.mrf.mxu1 }
 0x18b   : > { %v912_v18 = vadd.f32 %v911_v16, %v885_v14  ;;  %v943_v19 = vadd.f32 %v942_v17, %v920_v15 }
 0x18d   : > { %v978_v20 = vmul.f32 0.25, %v912_v18  ;;  %v982_v21 = vpack.c.bf16 %v943_v19, %v943_v19 }
 0x18f   : > { %v980_v22 = vpack.c.bf16 %v978_v20, %v978_v20  ;;  %v991_v23 = vsel %vm986_vm3, %v982_v21, 0  ;;  %v1095_v24 = vunpack.c.l.b16 %v982_v21 }
 0x190   : > { %1000 = vmatpush.bf16.xpose.msra.mxu3 %v991_v23 }
 0x191   : > { %v1096_v25 = vpack.c.b16 %v1095_v24, %v1095_v24  ;;  %v1090_v26 = vunpack.c.l.b16 %v980_v22  ;;  %v973_v7 = vpop.f32.mrf.mxu2 }
 0x192   : > { %v913_v27 = vpop.f32.mrf.mxu0  ;;  %v944_v28 = vpop.f32.mrf.mxu1  ;;  %v974_v8 = vadd.f32 %v973_v7, %v951_v6  ;;  %v1240_v7 = vperm.slane %v3317_v13, 3 }
 0x193   : > { %v914_v29 = vadd.f32 %v913_v27, %v885_v14  ;;  %v945_v30 = vadd.f32 %v944_v28, %v920_v15  ;;  %1097 = vrot.lane.b32.xlu0 %v1096_v25, %s2893_s12  ;;  %v1091_v31 = vpack.c.b16 %v1090_v26, %v1090_v26 }
 0x194   : > { %v984_v9 = vpack.c.bf16 %v974_v8, %v974_v8 }
 0x195   : > { %v979_v32 = vmul.f32 0.25, %v914_v29  ;;  %v983_v33 = vpack.c.bf16 %v945_v30, %v945_v30  ;;  %1092 = vrot.lane.b32.xlu1 %v1091_v31, %s2893_s12 }
 0x196   : > { %v1172_v12 = vunpack.c.l.b16 %v984_v9  ;;  %v1055_v16 = vsel %vm1053_vm5, %v984_v9, 0 }
 0x197   : > { %v981_v34 = vpack.c.bf16 %v979_v32, %v979_v32  ;;  %v1124_v35 = vunpack.c.l.b16 %v983_v33  ;;  %2021 = vmatmul.msk.bf16.vlgmr.msra.gmra.mxu3 %vm986_vm3, %v980_v22  ;;  %v1010_v36 = vsel %vm986_vm3, %v983_v33, 0  ;;  %1064 = vmatpush.bf16.msrb.mxu1 %v1055_v16 }
 0x198   : > { %1019 = vmatpush.bf16.xpose.msrb.mxu0 %v1010_v36  ;;  %v1173_v14 = vpack.c.b16 %v1172_v12, %v1172_v12 }
 0x199   : > { %v1119_v37 = vunpack.c.l.b16 %v981_v34  ;;  %v1125_v38 = vpack.c.b16 %v1124_v35, %v1124_v35  ;;  %v975_v15 = vpop.f32.mrf.mxu2 }
 0x19a   : > { %v976_v17 = vadd.f32 %v975_v15, %v951_v6 }
 0x19b   : > { %1126 = vrot.lane.b32.xlu0 %v1125_v38, %s2893_s12  ;;  %v1120_v39 = vpack.c.b16 %v1119_v37, %v1119_v37 }
 0x19c   : > { %v985_v18 = vpack.c.bf16 %v976_v17, %v976_v17 }
 0x19d   : > { %1121 = vrot.lane.b32.xlu1 %v1120_v39, %s2893_s12 }
 0x19e   : > { %v1074_v20 = vsel %vm1053_vm5, %v985_v18, 0  ;;  %v1196_v38 = vunpack.c.l.b16 %v985_v18 }
 0x19f   : > { %2022 = vmatmul.msk.bf16.vlgmr.msrb.gmra.mxu0 %vm986_vm3, %v981_v34  ;;  %1083 = vmatpush.bf16.msrb.mxu2 %v1074_v20 }
 0x1a0   : > { %v1197_v39 = vpack.c.b16 %v1196_v38, %v1196_v38 }
 0x205   : > { %v1098_v40 = vpop.permute.xlu0 %1097 }
 0x206   : > { %v1103_v41 = vsel %vm986_vm3, %v1098_v40, 0 }
 0x207   : > { %1112 = vmatpush.bf16.xpose.msrb.mxu3 %v1103_v41  ;;  %v1093_v44 = vpop.permute.xlu1 %1092 }
 0x20d   : > { %v1127_v45 = vpop.permute.xlu0 %1126 }
 0x20e   : > { %v1132_v46 = vsel %vm986_vm3, %v1127_v45, 0  ;;  %2025 = vmatmul.msk.bf16.vlgmr.msrb.gmra.mxu3 %vm986_vm3, %v1093_v44 }
 0x20f   : > { %1141 = vmatpush.bf16.xpose.msra.mxu0 %v1132_v46  ;;  %v1122_v47 = vpop.permute.xlu1 %1121 }
 0x216   : > { %2026 = vmatmul.msk.bf16.vlgmr.msra.gmra.mxu0 %vm986_vm3, %v1122_v47 }
 0x21a   : > { %v1002_v48 = vpop.f32.mrf.mxu3 }
 0x21b   : > { %v1026_v53 = vsel %vm1025_vm4, %v1002_v48, -inf }
 0x21c   : > { %v1021_v49 = vpop.f32.mrf.mxu0 }
 0x21d   : > { %v1029_v50 = vsel %vm1025_vm4, %v1021_v49, -inf }
 0x21e   : > { %1030 = vmax.xlane.f32.xlu2 %v1029_v50 }
 0x222   : > { %v1004_v51 = vpop.f32.mrf.mxu3 }
 0x224   : > { %v1023_v52 = vpop.f32.mrf.mxu0 }
 0x226   : > { %1027 = vmax.xlane.f32.xlu2 %v1026_v53 }
 0x291   : > { %v1031_v54 = vpop.xlane.xlu2 %1030  ;;  %v1114_v55 = vpop.f32.mrf.mxu3 }
 0x292   : > { %v1147_v56 = vsel %vm1025_vm4, %v1114_v55, -inf  ;;  %v1033_v63 = vsub.f32 %v1021_v49, %v1031_v54 }
 0x293   : > { %v1143_v57 = vpop.f32.mrf.mxu0  ;;  %1148 = vmax.xlane.f32.xlu1 %v1147_v56 }
 0x294   : > { %v1150_v58 = vsel %vm1025_vm4, %v1143_v57, -inf  ;;  %v1036_v1 = vmul.f32 1.442695, %v1033_v63 }
 0x295   : > { %1151 = vmax.xlane.f32.xlu0 %v1150_v58 }
 0x299   : > { %v1028_v59 = vpop.xlane.xlu2 %1027  ;;  %v1116_v60 = vpop.f32.mrf.mxu3 }
 0x29a   : > { %v1032_v61 = vsub.f32 %v1002_v48, %v1028_v59 }
 0x29b   : > { %v1145_v62 = vpop.f32.mrf.mxu0 }
 0x29c   : > { %v1034_v0 = vmul.f32 1.442695, %v1032_v61  ;;  %v2123_v61 = vld [vmem:[%s728_s16 + $0x8] sm:$0xff]  ;;  %v2122_v62 = vld [vmem:[%s728_s16] sm:$0xff] }
 0x29d   : > { %1267 = vmatpush.bf16.msra.mxu3 %v2123_v61 }
 0x29e   : > { %2337 = vpow2.f32 %v1034_v0 }
 0x29f   : > { %2339 = vpow2.f32 %v1036_v1 }
 0x2a1   : > { %1268 = vmatpush.bf16.msra.mxu3 %v2122_v62 }
 0x2a4   : > { %v2338_v2 = vpop.eup %2337 }
 0x2a5   : > { %v1038_v3 = vsel %vm1025_vm4, %v2338_v2, 0.0  ;;  %v2340_v4 = vpop.eup %2339 }
 0x2a6   : > { %1039 = vadd.xlane.f32.xlu2 %v1038_v3  ;;  %v1041_v5 = vsel %vm1025_vm4, %v2340_v4, 0.0 }
 0x2a9   : > { %1174 = vrot.lane.b32.xlu0 %v1173_v14, %s2893_s12 }
 0x2ae   : > { %1042 = vadd.xlane.f32.xlu2 %v1041_v5 }
 0x306   : > { %v1149_v19 = vpop.xlane.xlu1 %1148 }
 0x307   : > { %v1153_v21 = vsub.f32 %v1114_v55, %v1149_v19  ;;  %v2895_v19 = vmov 32.0  }
 0x308   : > { %v1152_v22 = vpop.xlane.xlu0 %1151 }
 0x309   : > { %v1155_v23 = vmul.f32 1.442695, %v1153_v21  ;;  %v1154_v24 = vsub.f32 %v1143_v57, %v1152_v22 }
 0x30b   : > { %2341 = vpow2.f32 %v1155_v23  ;;  %v1157_v25 = vmul.f32 1.442695, %v1154_v24 }
 0x30d   : > { %2343 = vpow2.f32 %v1157_v25 }
 0x311   : > { %v2342_v26 = vpop.eup %2341 }
 0x312   : > { %v1159_v27 = vsel %vm1025_vm4, %v2342_v26, 0.0 }
 0x313   : > { %1160 = vadd.xlane.f32.xlu2 %v1159_v27  ;;  %v2344_v28 = vpop.eup %2343 }
 0x314   : > { %v1162_v30 = vsel %vm1025_vm4, %v2344_v28, 0.0 }
 0x319   : > { %v1040_v29 = vpop.xlane.xlu2 %1039 }
 0x31a   : > { %2345 = vrcp.f32 %v1040_v29 }
 0x31b   : > { %1163 = vadd.xlane.f32.xlu2 %v1162_v30  ;;  %v1175_v40 = vpop.permute.xlu0 %1174 }
 0x31c   : > { %v1180_v41 = vsel %vm1053_vm5, %v1175_v40, 0 }
 0x31d   : > { %1189 = vmatpush.bf16.msra.mxu1 %v1180_v41 }
 0x320   : > { %v2346_v31 = vpop.eup %2345 }
 0x321   : > { %v1046_v32 = vmul.f32 %v2346_v31, %v2338_v2  ;;  %v1043_v33 = vpop.xlane.xlu2 %1042 }
 0x322   : > { %2347 = vrcp.f32 %v1043_v33 }
 0x323   : > { %v1048_v34 = vpack.c.bf16 %v1046_v32, %v1046_v32 }
 0x325   : > { %2023 = vmatmul.msk.bf16.vlgmr.msrb.gmra.mxu1 %vm1025_vm4, %v1048_v34  ;;  %v2125_v34 = vld [vmem:[%s738_s0 + $0x8] sm:$0xff] }
 0x326   : > { %1361 = vmatpush.bf16.msrb.mxu0 %v2125_v34 }
 0x328   : > { %v2348_v35 = vpop.eup %2347 }
 0x329   : > { %v1047_v36 = vmul.f32 %v2348_v35, %v2340_v4 }
 0x32b   : > { %v1049_v37 = vpack.c.bf16 %v1047_v36, %v1047_v36 }
 0x32d   : > { %2024 = vmatmul.msk.bf16.vlgmr.msrb.gmra.mxu2 %vm1025_vm4, %v1049_v37  ;;  %v2124_v37 = vld [vmem:[%s738_s0] sm:$0xff] }
 0x32e   : > { %1362 = vmatpush.bf16.msrb.mxu0 %v2124_v37 }
 0x333   : > { %1198 = vrot.lane.b32.xlu2 %v1197_v39, %s2893_s12 }
 0x386   : > { %v1161_v42 = vpop.xlane.xlu2 %1160 }
 0x387   : > { %2349 = vrcp.f32 %v1161_v42 }
 0x38d   : > { %v2350_v43 = vpop.eup %2349 }
 0x38e   : > { %v1167_v44 = vmul.f32 %v2350_v43, %v2342_v26  ;;  %v1164_v45 = vpop.xlane.xlu2 %1163 }
 0x38f   : > { %2351 = vrcp.f32 %v1164_v45 }
 0x390   : > { %v1169_v46 = vpack.c.bf16 %v1167_v44, %v1167_v44  ;;  %2353 = vrcp.f32 %v2895_v19 }
 0x392   : > { %2027 = vmatmul.msk.bf16.vlgmr.msra.gmra.mxu1 %vm1025_vm4, %v1169_v46 }
 0x395   : > { %v2352_v47 = vpop.eup %2351 }
 0x396   : > { %v1168_v48 = vmul.f32 %v2352_v47, %v2344_v28  ;;  %v1199_v49 = vpop.permute.xlu2 %1198  ;;  %v2354_v20 = vpop.eup %2353 }
 0x397   : > { %v1204_v50 = vsel %vm1053_vm5, %v1199_v49, 0  ;;  %v1284_v21 = vmul.f32 32.0, %v2354_v20  ;;  %vm1288_vm7 = vweird.f32 %v2354_v20 }
 0x398   : > { %v1170_v51 = vpack.c.bf16 %v1168_v48, %v1168_v48  ;;  %1213 = vmatpush.bf16.msra.mxu2 %v1204_v50 }
 0x399   : > { %v1285_v22 = vsub.f32 1.0, %v1284_v21 }
 0x39b   : > { %2028 = vmatmul.msk.bf16.vlgmr.msra.gmra.mxu2 %vm1025_vm4, %v1170_v51  ;;  %v1286_v23 = vmul.f32 %v2354_v20, %v1285_v22 }
 0x39d   : > { %v1287_v24 = vadd.f32 %v2354_v20, %v1286_v23 }
 0x3a2   : > { %v1066_v52 = vpop.f32.mrf.mxu1 }
 0x3aa   : > { %v1068_v53 = vpop.f32.mrf.mxu1 }
 0x3b0   : > { %v1085_v54 = vpop.f32.mrf.mxu2 }
 0x3b8   : > { %v1087_v55 = vpop.f32.mrf.mxu2 }
 0x40f   : > { %v1191_v56 = vpop.f32.mrf.mxu1 }
 0x417   : > { %v1193_v57 = vpop.f32.mrf.mxu1 }
 0x41e   : > { %v1215_v58 = vpop.f32.mrf.mxu2 }
 0x41f   : > { %v2332_v59 = vpack.i.bf16 %v1215_v58, %v1191_v56  ;;  %v1331_v58 = vperm.slane %v3317_v13, 7 }
 0x421   : > { %2333 = vrot.lane.b32.xlu1 %v2332_v59, %s2894_s18 }
 0x426   : > { %v1217_v60 = vpop.f32.mrf.mxu2 }
 0x493   : > { %v2334_v63 = vpop.permute.xlu1 %2333 }
 0x494   : > { %v2336_v0 = vunpack.i.h.bf16 %v2334_v63  ;;  %v2335_v1 = vunpack.i.l.bf16 %v2334_v63 }
 0x496   : > { %v1228_v2 = vsel %vm986_vm3, %v1085_v54, %v2336_v0  ;;  %v1227_v3 = vsel %vm986_vm3, %v1066_v52, %v2335_v1  ;;  %v1328_v54 = vperm.slane %v3317_v13, 6  ;;  %v2127_v1 = vld [vmem:[%s748_s8 + $0x8] sm:$0xff] }
 0x497   : > { %v1230_v4 = vpack.c.bf16 %v1228_v2, %v1228_v2  ;;  %v1229_v5 = vpack.c.bf16 %v1227_v3, %v1227_v3  ;;  %1398 = vmatpush.bf16.msrb.mxu1 %v2127_v1  ;;  %v2126_v2 = vld [vmem:[%s748_s8] sm:$0xff] }
 0x499   : > { %1233 = vst.msk [vmem:[#allocation3 + $0x4] sm:$0xf] %vm1231_vm6, %v1230_v4  ;;  %v1339_v4 = vperm.slane %v3317_v13, 4 }
 0x49a   : > { %1232 = vst.msk [vmem:[#allocation3] sm:$0xf] %vm1231_vm6, %v1229_v5 }
 0x49b   : > { %1399 = vmatpush.bf16.msrb.mxu1 %v2126_v2 }
 0x4a1   : > { %v2121_v6 = vld [vmem:[#allocation3] sm:$0xff] }
 0x4a2   : > { %2041 = vmatmul.msk.bf16.vlgmr.msra.gmra.mxu3 %vm898_vm2, %v2121_v6 }
 0x525   : > { %v1270_v8 = vpop.f32.mrf.mxu3 }
 0x526   : > { %v1271_v9 = vadd.f32 %v1270_v8, %v1240_v7 }
 0x528   : > { %v1275_v12 = vadd.f32 %v1271_v9, %v3308_v10  ;;  %v3369_v10 = vsel %vm1288_vm7, %v2354_v20, %v1287_v24 }
 0x52a   : > { %v1277_v14 = vsel %vm898_vm2, %v1275_v12, 0.0 }
 0x52b   : > { %1278 = vadd.xlane.f32.xlu2 %v1277_v14  ;;  %v1376_v14 = vperm.slane %v3317_v13, 5 }
 0x52d   : > { %v1272_v15 = vpop.f32.mrf.mxu3 }
 0x52e   : > { %v1273_v16 = vadd.f32 %v1272_v15, %v1240_v7 }
 0x530   : > { %v1276_v17 = vadd.f32 %v1273_v16, %v3310_v11 }
 0x532   : > { %v1280_v18 = vsel %vm898_vm2, %v1276_v17, 0.0 }
 0x533   : > { %1281 = vadd.xlane.f32.xlu0 %v1280_v18 }
 0x59e   : > { %v1279_v25 = vpop.xlane.xlu2 %1278 }
 0x59f   : > { %v1290_v26 = vmul.f32 %v3369_v10, %v1279_v25 }
 0x5a1   : > { %v1292_v27 = vsub.f32 %v1275_v12, %v1290_v26 }
 0x5a3   : > { %v1294_v11 = vmul.f32 %v1292_v27, %v1292_v27 }
 0x5a5   : > { %v1296_v28 = vsel %vm898_vm2, %v1294_v11, 0.0 }
 0x5a6   : > { %v1282_v29 = vpop.xlane.xlu0 %1281  ;;  %1297 = vadd.xlane.f32.xlu1 %v1296_v28 }
 0x5a7   : > { %v1291_v30 = vmul.f32 %v3369_v10, %v1282_v29 }
 0x5a9   : > { %v1293_v31 = vsub.f32 %v1276_v17, %v1291_v30 }
 0x5ab   : > { %v1295_v32 = vmul.f32 %v1293_v31, %v1293_v31 }
 0x5ad   : > { %v1299_v33 = vsel %vm898_vm2, %v1295_v32, 0.0 }
 0x5ae   : > { %1300 = vadd.xlane.f32.xlu2 %v1299_v33 }
 0x619   : > { %v1298_v35 = vpop.xlane.xlu1 %1297 }
 0x61a   : > { %v1302_v36 = vmul.f32 %v1298_v35, %v3369_v10 }
 0x61c   : > { %v1304_v38 = vadd.f32 1e-05, %v1302_v36 }
 0x61e   : > { %2355 = vrsqrt.f32 %v1304_v38  ;;  %vm1312_vm9 = vweird.f32 %v1304_v38 }
 0x621   : > { %v1301_v39 = vpop.xlane.xlu2 %1300 }
 0x622   : > { %v1303_v40 = vmul.f32 %v1301_v39, %v3369_v10 }
 0x624   : > { %v2356_v41 = vpop.eup %2355  ;;  %v1305_v42 = vadd.f32 1e-05, %v1303_v40 }
 0x625   : > { %v1307_v43 = vmul.f32 %v2356_v41, %v1304_v38  ;;  %vm1313_vm8 = vweird.f32 %v2356_v41 }
 0x626   : > { %2357 = vrsqrt.f32 %v1305_v42  ;;  %vm1314_vm10 = vmor %vm1312_vm9, %vm1313_vm8  ;;  %vm1322_vm12 = vweird.f32 %v1305_v42 }
 0x627   : > { %v1308_v44 = vmul.f32 %v2356_v41, %v1307_v43 }
 0x629   : > { %v1309_v45 = vmul.f32 0.5, %v1308_v44 }
 0x62b   : > { %v1310_v46 = vsub.f32 1.5, %v1309_v45 }
 0x62c   : > { %v2358_v47 = vpop.eup %2357 }
 0x62d   : > { %v1311_v48 = vmul.f32 %v2356_v41, %v1310_v46  ;;  %v1317_v49 = vmul.f32 %v2358_v47, %v1305_v42  ;;  %vm1323_vm11 = vweird.f32 %v2358_v47 }
 0x62e   : > { %vm1324_vm13 = vmor %vm1322_vm12, %vm1323_vm11 }
 0x62f   : > { %v1318_v50 = vmul.f32 %v2358_v47, %v1317_v49  ;;  %v1315_v51 = vsel %vm1314_vm10, %v2356_v41, %v1311_v48  ;;  %v877_v41 = vld [vmem:[%s3290_s17 + $0x8] sm:$0x3] }
 0x630   : > { %v1326_v55 = vmul.f32 %v1315_v51, %v1292_v27  ;;  %v1452_v46 = vperm.slane %v877_v41, 0  ;;  %v1455_v49 = vperm.slane %v877_v41, 1 }
 0x631   : > { %v1319_v52 = vmul.f32 0.5, %v1318_v50 }
 0x632   : > { %v1329_v59 = vmul.f32 %v1328_v54, %v1326_v55 }
 0x633   : > { %v1320_v53 = vsub.f32 1.5, %v1319_v52 }
 0x634   : > { %v1332_v62 = vadd.f32 %v1331_v58, %v1329_v59 }
 0x635   : > { %v1321_v56 = vmul.f32 %v2358_v47, %v1320_v53 }
 0x637   : > { %v1325_v57 = vsel %vm1324_vm13, %v2358_v47, %v1321_v56 }
 0x638   : > { %v1327_v60 = vmul.f32 %v1325_v57, %v1293_v31 }
 0x63a   : > { %v1330_v61 = vmul.f32 %v1328_v54, %v1327_v60 }
 0x63c   : > { %v1333_v63 = vadd.f32 %v1331_v58, %v1330_v61 }
 0x63e   : > { %v1334_v0 = vpack.c.bf16 %v1333_v63, %v1332_v62 }
 0x640   : > { %2050 = vmatmul.msk.bf16.vlgmr.msrb.gmra.mxu0 %vm898_vm2, %v1334_v0 }
 0x6bd   : > { %v1364_v3 = vpop.f32.mrf.mxu0 }
 0x6be   : > { %v1365_v5 = vadd.f32 %v1364_v3, %v1339_v4 }
 0x6c0   : > { %v1369_v8 = vmax.f32 %v1365_v5, 0.0 }
 0x6c5   : > { %v1366_v6 = vpop.f32.mrf.mxu0 }
 0x6c6   : > { %v1367_v7 = vadd.f32 %v1366_v6, %v1339_v4 }
 0x6c8   : > { %v1370_v9 = vmax.f32 %v1367_v7, 0.0 }
 0x6ca   : > { %v1371_v12 = vpack.c.bf16 %v1370_v9, %v1369_v8 }
 0x6cc   : > { %2059 = vmatmul.msk.bf16.vlgmr.msrb.gmra.mxu1 %vm898_vm2, %v1371_v12 }
 0x749   : > { %v1401_v15 = vpop.f32.mrf.mxu1 }
 0x74a   : > { %v1402_v16 = vadd.f32 %v1401_v15, %v1376_v14 }
 0x74c   : > { %v1406_v17 = vadd.f32 %v1402_v16, %v1332_v62 }
 0x74e   : > { %v1408_v18 = vsel %vm898_vm2, %v1406_v17, 0.0 }
 0x74f   : > { %1409 = vadd.xlane.f32.xlu0 %v1408_v18 }
 0x751   : > { %v1403_v19 = vpop.f32.mrf.mxu1 }
 0x752   : > { %v1404_v20 = vadd.f32 %v1403_v19, %v1376_v14 }
 0x754   : > { %v1407_v21 = vadd.f32 %v1404_v20, %v1333_v63 }
 0x756   : > { %v1411_v22 = vsel %vm898_vm2, %v1407_v21, 0.0 }
 0x757   : > { %1412 = vadd.xlane.f32.xlu2 %v1411_v22 }
 0x7c2   : > { %v1410_v23 = vpop.xlane.xlu0 %1409 }
 0x7c3   : > { %v1414_v24 = vmul.f32 %v1410_v23, %v3369_v10 }
 0x7c5   : > { %v1416_v25 = vsub.f32 %v1406_v17, %v1414_v24 }
 0x7c7   : > { %v1418_v26 = vmul.f32 %v1416_v25, %v1416_v25 }
 0x7c9   : > { %v1420_v27 = vsel %vm898_vm2, %v1418_v26, 0.0 }
 0x7ca   : > { %v1413_v13 = vpop.xlane.xlu2 %1412  ;;  %1421 = vadd.xlane.f32.xlu1 %v1420_v27 }
 0x7cb   : > { %v1415_v11 = vmul.f32 %v1413_v13, %v3369_v10 }
 0x7cd   : > { %v1417_v28 = vsub.f32 %v1407_v21, %v1415_v11 }
 0x7cf   : > { %v1419_v29 = vmul.f32 %v1417_v28, %v1417_v28 }
 0x7d1   : > { %v1423_v30 = vsel %vm898_vm2, %v1419_v29, 0.0 }
 0x7d2   : > { %1424 = vadd.xlane.f32.xlu0 %v1423_v30 }
 0x83d   : > { %v1422_v31 = vpop.xlane.xlu1 %1421 }
 0x83e   : > { %v1426_v32 = vmul.f32 %v1422_v31, %v3369_v10 }
 0x840   : > { %v1428_v33 = vadd.f32 1e-05, %v1426_v32 }
 0x842   : > { %2359 = vrsqrt.f32 %v1428_v33  ;;  %vm1436_vm15 = vweird.f32 %v1428_v33 }
 0x845   : > { %v1425_v34 = vpop.xlane.xlu0 %1424 }
 0x846   : > { %v1427_v35 = vmul.f32 %v1425_v34, %v3369_v10 }
 0x848   : > { %v2360_v36 = vpop.eup %2359  ;;  %v1429_v37 = vadd.f32 1e-05, %v1427_v35 }
 0x849   : > { %v1431_v38 = vmul.f32 %v2360_v36, %v1428_v33  ;;  %vm1437_vm14 = vweird.f32 %v2360_v36 }
 0x84a   : > { %2361 = vrsqrt.f32 %v1429_v37  ;;  %vm1438_vm0 = vmor %vm1436_vm15, %vm1437_vm14  ;;  %vm1446_vm3 = vweird.f32 %v1429_v37 }
 0x84b   : > { %v1432_v39 = vmul.f32 %v2360_v36, %v1431_v38 }
 0x84d   : > { %v1433_v40 = vmul.f32 0.5, %v1432_v39 }
 0x84f   : > { %v1434_v42 = vsub.f32 1.5, %v1433_v40 }
 0x850   : > { %v2362_v43 = vpop.eup %2361 }
 0x851   : > { %v1435_v44 = vmul.f32 %v2360_v36, %v1434_v42  ;;  %v1441_v45 = vmul.f32 %v2362_v43, %v1429_v37  ;;  %vm1447_vm1 = vweird.f32 %v2362_v43 }
 0x852   : > { %vm1448_vm4 = vmor %vm1446_vm3, %vm1447_vm1 }
 0x853   : > { %v1439_v47 = vsel %vm1438_vm0, %v2360_v36, %v1435_v44  ;;  %v1442_v48 = vmul.f32 %v2362_v43, %v1441_v45 }
 0x854   : > { %v1450_v50 = vmul.f32 %v1439_v47, %v1416_v25 }
 0x855   : > { %v1443_v51 = vmul.f32 0.5, %v1442_v48 }
 0x856   : > { %v1453_v52 = vmul.f32 %v1452_v46, %v1450_v50 }
 0x857   : > { %v1444_v53 = vsub.f32 1.5, %v1443_v51 }
 0x858   : > { %v1456_v54 = vadd.f32 %v1455_v49, %v1453_v52 }
 0x859   : > { %v1445_v55 = vmul.f32 %v2362_v43, %v1444_v53 }
 0x85a   : > { %1458 = vst.msk [vmem:[#allocation2] sm:$0xff] %vm898_vm2, %v1456_v54 }
 0x85b   : > { %v1449_v56 = vsel %vm1448_vm4, %v2362_v43, %v1445_v55 }
 0x85c   : > { %v1451_v57 = vmul.f32 %v1449_v56, %v1417_v28 }
 0x85e   : > { %v1454_v58 = vmul.f32 %v1452_v46, %v1451_v57  ;;  %1463 = sbr.rel (%p2060_p6) target bundleno = 2958 (0xb8e), region = 136 }
 0x860   : > { %v1457_v59 = vadd.f32 %v1455_v49, %v1454_v58 }
 0x862   : > { %1459 = vst.msk [vmem:[#allocation2 + $0x8] sm:$0xff] %vm898_vm2, %v1457_v59 }
 0x863   : > { %v1466_v60 = vsel %vm898_vm2, %v1456_v54, 0.0  ;;  %v1469_v61 = vsel %vm898_vm2, %v1457_v59, 0.0  ;;  %v2129_v8 = vld [vmem:[#allocation18 + $0x8] sm:$0xff]  ;;  %v2128_v9 = vld [vmem:[#allocation18] sm:$0xff]  ;;  %v2137_v16 = vld [vmem:[%s3581_s14 + $0x38] sm:$0xff] }
 0x864   : > { %1467 = vadd.xlane.f32.xlu0 %v1466_v60  ;;  %1550 = vmatpush.bf16.msra.mxu0 %v2129_v8  ;;  %v2136_v19 = vld [vmem:[%s3581_s14 + $0x30] sm:$0xff]  ;;  %v2135_v23 = vld [vmem:[%s3581_s14 + $0x28] sm:$0xff]  ;;  %v2363_v33 = vld [vmem:[#allocation15] ss:$0 sm:$0xff] }
 0x865   : > { %1629 = vmatpush.bf16.msra.mxu1 %v2137_v16  ;;  %v2364_v38 = vld [vmem:[#allocation16] ss:$0 sm:$0xff]  ;;  %v2133_v43 = vld [vmem:[%s3581_s14 + $0x18] sm:$0xff]  ;;  %v2132_v44 = vld [vmem:[%s3581_s14 + $0x10] sm:$0xff] }
 0x866   : > { %v2131_v45 = vld [vmem:[%s3581_s14 + $0x8] sm:$0xff]  ;;  %v2130_v46 = vld [vmem:[%s3581_s14] sm:$0xff]  ;;  %v2365_v48 = vld [vmem:[#allocation19] ss:$0 sm:$0xff] }
 0x867   : > { %v2366_v55 = vld [vmem:[%s3582_s5] ss:$0 sm:$0xff] }
 0x868   : > { %1551 = vmatpush.bf16.msra.mxu0 %v2128_v9 }
 0x869   : > { %1630 = vmatpush.bf16.msra.mxu1 %v2136_v19 }
 0x86c   : > { %1470 = vadd.xlane.f32.xlu0 %v1469_v61 }
 0x86d   : > { %1631 = vmatpush.bf16.msra.mxu1 %v2135_v23 }
 0x8d7   : > { %v1468_v62 = vpop.xlane.xlu0 %1467 }
 0x8d8   : > { %v1472_v63 = vmul.f32 %v1468_v62, %v3369_v10 }
 0x8da   : > { %v1474_v0 = vsub.f32 %v1456_v54, %v1472_v63 }
 0x8dc   : > { %v1476_v1 = vmul.f32 %v1474_v0, %v1474_v0 }
 0x8de   : > { %v1478_v2 = vsel %vm898_vm2, %v1476_v1, 0.0 }
 0x8df   : > { %1479 = vadd.xlane.f32.xlu1 %v1478_v2  ;;  %v1471_v3 = vpop.xlane.xlu0 %1470 }
 0x8e0   : > { %v1473_v4 = vmul.f32 %v1471_v3, %v3369_v10 }
 0x8e2   : > { %v1475_v5 = vsub.f32 %v1457_v59, %v1473_v4 }
 0x8e4   : > { %v1477_v6 = vmul.f32 %v1475_v5, %v1475_v5 }
 0x8e6   : > { %v1481_v7 = vsel %vm898_vm2, %v1477_v6, 0.0 }
 0x8e7   : > { %1482 = vadd.xlane.f32.xlu1 %v1481_v7 }
 0x952   : > { %v1480_v12 = vpop.xlane.xlu1 %1479 }
 0x953   : > { %v1484_v14 = vmul.f32 %v1480_v12, %v3369_v10 }
 0x955   : > { %v1486_v15 = vadd.f32 1e-05, %v1484_v14 }
 0x957   : > { %2367 = vrsqrt.f32 %v1486_v15  ;;  %vm1494_vm6 = vweird.f32 %v1486_v15 }
 0x95a   : > { %v1483_v17 = vpop.xlane.xlu1 %1482 }
 0x95b   : > { %v1485_v18 = vmul.f32 %v1483_v17, %v3369_v10  ;;  %v2134_v10 = vld [vmem:[%s3581_s14 + $0x20] sm:$0xff] }
 0x95c   : > { %1632 = vmatpush.bf16.msra.mxu1 %v2134_v10 }
 0x95d   : > { %v2368_v20 = vpop.eup %2367  ;;  %v1487_v21 = vadd.f32 1e-05, %v1485_v18 }
 0x95e   : > { %v1489_v22 = vmul.f32 %v2368_v20, %v1486_v15  ;;  %vm1495_vm5 = vweird.f32 %v2368_v20 }
 0x95f   : > { %2369 = vrsqrt.f32 %v1487_v21  ;;  %vm1496_vm7 = vmor %vm1494_vm6, %vm1495_vm5  ;;  %vm1504_vm9 = vweird.f32 %v1487_v21 }
 0x960   : > { %v1490_v24 = vmul.f32 %v2368_v20, %v1489_v22  ;;  %1633 = vmatpush.bf16.msra.mxu1 %v2133_v43 }
 0x962   : > { %v1491_v25 = vmul.f32 0.5, %v1490_v24 }
 0x964   : > { %v1492_v26 = vsub.f32 1.5, %v1491_v25  ;;  %1634 = vmatpush.bf16.msra.mxu1 %v2132_v44 }
 0x965   : > { %v2370_v27 = vpop.eup %2369 }
 0x966   : > { %v1493_v13 = vmul.f32 %v2368_v20, %v1492_v26  ;;  %v1499_v11 = vmul.f32 %v2370_v27, %v1487_v21  ;;  %vm1505_vm8 = vweird.f32 %v2370_v27 }
 0x967   : > { %vm1506_vm10 = vmor %vm1504_vm9, %vm1505_vm8 }
 0x968   : > { %v1500_v28 = vmul.f32 %v2370_v27, %v1499_v11  ;;  %v1497_v30 = vsel %vm1496_vm7, %v2368_v20, %v1493_v13  ;;  %1635 = vmatpush.bf16.msra.mxu1 %v2131_v45 }
 0x969   : > { %v1508_v32 = vmul.f32 %v1497_v30, %v1474_v0 }
 0x96a   : > { %v1501_v29 = vmul.f32 0.5, %v1500_v28 }
 0x96b   : > { %v1513_v37 = vmul.f32 %v2363_v33, %v1508_v32 }
 0x96c   : > { %v1502_v31 = vsub.f32 1.5, %v1501_v29  ;;  %1636 = vmatpush.bf16.msra.mxu1 %v2130_v46 }
 0x96d   : > { %v1518_v40 = vadd.f32 %v2364_v38, %v1513_v37 }
 0x96e   : > { %v1503_v34 = vmul.f32 %v2370_v27, %v1502_v31 }
 0x970   : > { %v1507_v35 = vsel %vm1506_vm10, %v2370_v27, %v1503_v34 }
 0x971   : > { %v1509_v36 = vmul.f32 %v1507_v35, %v1475_v5 }
 0x973   : > { %v1514_v39 = vmul.f32 %v2363_v33, %v1509_v36 }
 0x975   : > { %v1519_v41 = vadd.f32 %v2364_v38, %v1514_v39 }
 0x977   : > { %v1520_v42 = vpack.c.bf16 %v1519_v41, %v1518_v40 }
 0x979   : > { %2069 = vmatmul.msk.bf16.vlgmr.msra.gmra.mxu0 %vm898_vm2, %v1520_v42 }
 0x9f6   : > { %v1553_v47 = vpop.f32.mrf.mxu0 }
 0x9f7   : > { %v1554_v49 = vadd.f32 %v2365_v48, %v1553_v47 }
 0x9f9   : > { %v1558_v52 = vmax.f32 %v1554_v49, 0.0 }
 0x9fe   : > { %v1555_v50 = vpop.f32.mrf.mxu0 }
 0x9ff   : > { %v1556_v51 = vadd.f32 %v2365_v48, %v1555_v50 }
 0xa01   : > { %v1559_v53 = vmax.f32 %v1556_v51, 0.0 }
 0xa03   : > { %v1560_v54 = vpack.c.bf16 %v1559_v53, %v1558_v52 }
 0xa05   : > { %1637 = vmatmul.bf16.vlgmr.msra.gmra.mxu1 %v1560_v54 }
 0xa82   : > { %v1638_v56 = vpop.f32.mrf.mxu1 }
 0xa83   : > { %v1639_v57 = vadd.f32 %v2366_v55, %v1638_v56 }
 0xa85   : > { %1643 = vmax.xlane.f32.xlu2 %v1639_v57 }
 0xa8a   : > { %v1640_v58 = vpop.f32.mrf.mxu1 }
 0xa8b   : > { %v1641_v59 = vadd.f32 %v2366_v55, %v1640_v58 }
 0xa8d   : > { %1645 = vmax.xlane.f32.xlu2 %v1641_v59 }
 0xaf8   : > { %v1644_v60 = vpop.xlane.xlu2 %1643 }
 0xaf9   : > { %v1647_v61 = vsub.f32 %v1639_v57, %v1644_v60 }
 0xafb   : > { %v1649_v62 = vmul.f32 1.442695, %v1647_v61 }
 0xafd   : > { %2371 = vpow2.f32 %v1649_v62 }
 0xb00   : > { %v1646_v63 = vpop.xlane.xlu2 %1645 }
 0xb01   : > { %v1648_v0 = vsub.f32 %v1641_v59, %v1646_v63 }
 0xb03   : > { %v2372_v1 = vpop.eup %2371  ;;  %v1651_v2 = vmul.f32 1.442695, %v1648_v0 }
 0xb04   : > { %1653 = vadd.xlane.f32.xlu0 %v2372_v1 }
 0xb05   : > { %2373 = vpow2.f32 %v1651_v2 }
 0xb0b   : > { %v2374_v3 = vpop.eup %2373 }
 0xb0c   : > { %1655 = vadd.xlane.f32.xlu1 %v2374_v3 }
 0xb77   : > { %v1654_v4 = vpop.xlane.xlu0 %1653 }
 0xb78   : > { %2375 = vlog2.f32 %v1654_v4 }
 0xb7e   : > { %v2376_v5 = vpop.eup %2375 }
 0xb7f   : > { %v1658_v6 = vmul.f32 0.6931472, %v2376_v5  ;;  %v1656_v7 = vpop.xlane.xlu1 %1655 }
 0xb80   : > { %2377 = vlog2.f32 %v1656_v7 }
 0xb81   : > { %v1661_v8 = vadd.f32 %v1658_v6, %v1644_v60 }
 0xb83   : > { %v1663_v9 = vsub.f32 %v1639_v57, %v1661_v8 }
 0xb85   : > { %1665 = vst [vmem:[%s3293_s19] sm:$0xff] %v1663_v9 }
 0xb86   : > { %v2378_v12 = vpop.eup %2377 }
 0xb87   : > { %v1660_v14 = vmul.f32 0.6931472, %v2378_v12 }
 0xb89   : > { %v1662_v15 = vadd.f32 %v1660_v14, %v1646_v63 }
 0xb8b   : > { %v1664_v16 = vsub.f32 %v1641_v59, %v1662_v15 }
 0xb8d   : > { %1666 = vst [vmem:[%s3293_s19 + $0x8] sm:$0xff] %v1664_v16 }
 0xb8e PF: > { %s3583_s10 = sld [smem:[#allocation32_spill]]  ;;  %s1680_s0 = sshll.u32 %s3293_s19, 4  ;;  %s1681_s0 = int_to_ptr.vmem [resolvable:$true] %s1680_s0 }
 0xb8f   : > { %s3584_s2 = sld [smem:[#allocation53_spill]]  ;;  %s1668_s11 = scalar_lea.sflag [#allocation6], %s681_s15 }
 0xb94   : > { %s2138_s23 = sshll.u32 %s3583_s10, 4 }
 0xb95   : > { %s1679_s16 = scalar_lea.hbm %s3584_s2, %s2138_s23  ;;  %s2759_s30 = scalar_lea.hbm %s3584_s2, 32 }
 0xb96   : > { %s1682_s8 = sshll.u32 %s1679_s16, 4  ;;  %s1683_s8 = int_to_ptr.hbm [resolvable:$true] %s1682_s8 }
 0xb97   : > { %s2753_s24 = sshra.s32 %s1683_s8, 4  ;;  %s2754_s24 = int_to_ptr.hbm [resolvable:$true] %s2753_s24 }
 0xb98   : > { %s2755_s1 = scalar_lea.hbm %s2754_s24, 16  ;;  %p2760_p9 = scmp.lt.s32.totalorder %s2754_s24, %s3584_s2 }
 0xb99   : > { %p2756_p8 = scmp.ne.s32.totalorder %s2754_s24, %s2755_s1  ;;  %p2761_p3 = scmp.lt.s32.totalorder %s2759_s30, %s2755_s1 }
 0xb9b   : > { %p2757_p2 = pnand %p2756_p8, %p3100_p4  ;;  %p2762_p11 = por %p2761_p3, %p2760_p9 }
 0xb9d   : > { %p2758_p1 = pneg %p2757_p2 }
 0xb9f   : > { %p2763_p12 = pnand %p2762_p11, %p2758_p1 }
 0xba1   : > { %2766 = shalt.err (!%p2763_p12)
}
 0xba2   : > { %s2896_s15 = smov 128   ;;  %s2897_s19 = smov 8  }
 0xba3   : > { %2173 = dma.vmem_to_hbm [thread:$0]  (%p3100_p4), %s1681_s0, 256, %s1683_s8, %s1668_s11, %s2896_s15, %s2896_s15, %s2897_s19  }
 0xba4 PF: > { %p2228_p0 = scmp.ge.s32.totalorder %s2881_s28, 2  ;;  %s1697_s18 = sand.u32 1, %s2853_s21  }
 0xba5   : > { %s1698_s5 = scalar_lea.sflag [#allocation6], %s1697_s18 }
 0xba6   : > { %p2214_p5 = pnand %p2228_p0, %p3107_p10 }
 0xba8   : > { %p2215_p7 = pneg %p2214_p5 }
 0xbaa   : > { %2836 = dma.done.wait (%p2215_p7), %s1698_s5, 256  }
 0xbab   : > { %2838 = vsyncadd (%p2215_p7), %s1698_s5, 4294967040  ;;  %s34_s28 = sadd.s32 1, %s2881_s28   ;;  %s3586_s18 = sld [smem:[#allocation29_spill]] }
 0xbac   : > { %p31_p13 = scmp.ge.s32.totalorder %s34_s28, 6   ;;  %s3587_s10 = sld [smem:[#allocation36_spill]] }
 0xbad   : > { %s3588_s13 = sld [smem:[#allocation30_spill]]  ;;  %s3592_s19 = smov %s2849_s20 }
 0xbae   : > { %s3589_s23 = sld [smem:[#allocation37_spill]]  ;;  %s3594_s21 = smov %s2857_s22 }
 0xbaf   : > { %s3590_s7 = sld [smem:[#allocation33_spill]]  ;;  %s3596_s24 = smov %s2873_s26 }
 0xbb0   : > { %s3591_s16 = sld [smem:[#allocation34_spill]]  ;;  %s3597_s25 = smov %s2877_s27 }
 0xbb2   : > { %s3593_s20 = smov %s3587_s10  ;;  %33 = sbr.rel (!%p31_p13) target bundleno = 27 (0x1b), region = 222 }
 0xbb3   : > { %s3595_s22 = smov %s3588_s13 }
 0xbb5   : > { %s3598_s26 = smov %s3590_s7 }
 0xbb6   : > { %s3599_s27 = smov %s3591_s16 }
 0xbb7   :  { %1704 = vsyncpa [#allocation5], 1 }
 0xbb8   :  { %1706 = vsyncpa [#allocation5 + $0x1], 1 }
 0xbb9   :  { %1707 = vsyncpa [#allocation8], 1 }
 0xbba   :  { %1708 = vsyncpa [#allocation17], 1 }
 0xbbb   :  { %1709 = vsyncpa [#allocation20], 1 }
 0xbbc   :  { %1710 = vsyncpa [#allocation6], 1 }
 0xbbd   :  { %1712 = vsyncpa [#allocation6 + $0x1], 1 }

</bundles_post_ra>
